<compile_context>
chip_gen: v7x
topology: tpu7x:2x2x1
jax: 0.10.0
libtpu: 0.0.40
codegen_flags: <defaults>
</compile_context>

<pallas_src>
import functools
import math

import jax
import jax.numpy as jnp
from jax import lax
from jax.experimental import pallas as pl
from jax.experimental.pallas import tpu as pltpu

LN_EPS = 1e-5                       # PyTorch nn.LayerNorm default
VMEM_LIMIT = 64 * 1024 * 1024       # <= v7x physical 64 MiB; ample on v5e/v6e
INV_SQRT2 = 1.0 / math.sqrt(2.0)


# ------------------------------ tile helpers -------------------------------- #
def _tile(dim, pref, align):
    """Largest tile <= pref that divides `dim` and is a multiple of `align`;
    falls back to the full dim (block == array dim is always legal)."""
    if dim <= pref:
        return dim
    t = (pref // align) * align
    while t >= align:
        if dim % t == 0:
            return t
        t -= align
    return dim


def _gelu_exact(y):
    # nn.GELU(approximate='none')
    return 0.5 * y * (1.0 + lax.erf(y * INV_SQRT2))


# ----------------------------- LN statistics pre-pass ------------------------ #
def _ln_stats_kernel(x_ref, mu_ref, rstd_ref):
    xf = x_ref[...].astype(jnp.float32)
    mu = jnp.mean(xf, axis=-1, keepdims=True)
    var = jnp.mean(jnp.square(xf - mu), axis=-1, keepdims=True)
    mu_ref[...] = mu
    rstd_ref[...] = lax.rsqrt(var + LN_EPS)


def ln_stats(x, *, tm=256):
    """Per-row mean / rstd of x (M, D) in f32 — tiny pre-pass feeding the
    fused-LN matmul kernels (gamma/beta are folded into W / b at prep time)."""
    M, D = x.shape
    tm = _tile(M, tm, 8)
    return pl.pallas_call(
        _ln_stats_kernel,
        out_shape=(jax.ShapeDtypeStruct((M, 1), jnp.float32),
                   jax.ShapeDtypeStruct((M, 1), jnp.float32)),
        grid_spec=pltpu.PrefetchScalarGridSpec(
            num_scalar_prefetch=0,
            grid=(M // tm,),
            in_specs=[pl.BlockSpec((tm, D), lambda i: (i, 0))],
            out_specs=[pl.BlockSpec((tm, 1), lambda i: (i, 0)),
                       pl.BlockSpec((tm, 1), lambda i: (i, 0))]),
        compiler_params=pltpu.CompilerParams(
            dimension_semantics=("parallel",),
            vmem_limit_bytes=VMEM_LIMIT),
    )(x)


# ------------------------------- linear kernel ------------------------------- #
def _linear_kernel(*refs, fuse_ln, activation, has_residual, single_k):
    """y = [(x - mu) * rstd] @ W + b [GELU] [+ residual], K-tiled, f32 acc.
    (LN gamma/beta are already folded into W/b by prepare_kernel_params.)"""
    it = iter(refs)
    x_ref, w_ref, b_ref = next(it), next(it), next(it)
    mu_ref = rstd_ref = r_ref = None
    if fuse_ln:
        mu_ref, rstd_ref = next(it), next(it)
    if has_residual:
        r_ref = next(it)
    o_ref = next(it)
    acc_ref = None if single_k else next(it)

    k = pl.program_id(2)

    x = x_ref[...]
    if fuse_ln:
        x = ((x.astype(jnp.float32) - mu_ref[...]) * rstd_ref[...]).astype(x_ref.dtype)
    part = jnp.dot(x, w_ref[...], preferred_element_type=jnp.float32)

    def _finish(acc):
        y = acc + b_ref[...].astype(jnp.float32)
        if activation == "gelu":
            y = _gelu_exact(y)
        if has_residual:
            y = y + r_ref[...].astype(jnp.float32)
        o_ref[...] = y.astype(o_ref.dtype)

    if single_k:
        _finish(part)            # no accumulator round trip for a 1-step K grid
    else:
        @pl.when(k == 0)
        def _init():
            acc_ref[...] = jnp.zeros_like(acc_ref)

        acc_ref[...] += part

        @pl.when(k == pl.num_programs(2) - 1)
        def _finalize():
            _finish(acc_ref[...])


def linear(x, w, b, *, mu=None, rstd=None, activation=None, residual=None,
           tm=512, tn=512, tk=1024):
    """y = [LN-normalized x] @ w + b [GELU] [+ residual].  w is (K, N)."""
    M, K = x.shape
    K2, N = w.shape
    assert K == K2
    fuse_ln = mu is not None
    has_residual = residual is not None

    tm = _tile(M, tm, 8)
    tn = _tile(N, tn, 128)
    tk = _tile(K, tk, 128)
    grid = (M // tm, N // tn, K // tk)
    single_k = grid[2] == 1

    in_specs = [
        pl.BlockSpec((tm, tk), lambda i, j, k: (i, k)),
        pl.BlockSpec((tk, tn), lambda i, j, k: (k, j)),
        pl.BlockSpec((1, tn), lambda i, j, k: (0, j)),
    ]
    args = [x, w, b.reshape(1, N)]
    if fuse_ln:
        in_specs += [pl.BlockSpec((tm, 1), lambda i, j, k: (i, 0)),
                     pl.BlockSpec((tm, 1), lambda i, j, k: (i, 0))]
        args += [mu, rstd]
    io_aliases = {}
    if has_residual:
        in_specs.append(pl.BlockSpec((tm, tn), lambda i, j, k: (i, j)))
        args.append(residual)
        io_aliases = {len(args) - 1: 0}     # residual buffer aliases the output

    kernel = functools.partial(_linear_kernel, fuse_ln=fuse_ln,
                               activation=activation,
                               has_residual=has_residual, single_k=single_k)
    itemsize = x.dtype.itemsize
    cost = pl.CostEstimate(
        flops=2 * M * N * K,
        transcendentals=(M * N) if activation == "gelu" else 0,
        bytes_accessed=(x.size + w.size + b.size + M * N
                        + (residual.size if has_residual else 0)) * itemsize)

    return pl.pallas_call(
        kernel,
        out_shape=jax.ShapeDtypeStruct((M, N), x.dtype),
        grid_spec=pltpu.PrefetchScalarGridSpec(
            num_scalar_prefetch=0,
            grid=grid,
            in_specs=in_specs,
            out_specs=pl.BlockSpec((tm, tn), lambda i, j, k: (i, j)),
            scratch_shapes=([] if single_k
                            else [pltpu.VMEM((tm, tn), jnp.float32)]),
        ),
        compiler_params=pltpu.CompilerParams(
            dimension_semantics=("parallel", "parallel", "arbitrary"),
            vmem_limit_bytes=VMEM_LIMIT),
        input_output_aliases=io_aliases,
        cost_estimate=cost,
    )(*args)


# ------------------------------ fused MLP kernel ----------------------------- #
def _fused_mlp_kernel(x_ref, mu_ref, rstd_ref, wu_ref, bu_ref, wd_ref, bd_ref,
                      r_ref, o_ref, *maybe_acc, single_h):
    """acc += GELU( ((x-mu)*rstd) @ Wup[:,h] + bup[h] ) @ Wdown[h,:]  over h,
    finalize with bias + residual.  The (M, 4D) hidden never hits HBM."""
    h = pl.program_id(1)

    xn = ((x_ref[...].astype(jnp.float32) - mu_ref[...]) * rstd_ref[...]
          ).astype(x_ref.dtype)
    hid = jnp.dot(xn, wu_ref[...], preferred_element_type=jnp.float32)
    hid = _gelu_exact(hid + bu_ref[...].astype(jnp.float32))
    part = jnp.dot(hid.astype(x_ref.dtype), wd_ref[...],
                   preferred_element_type=jnp.float32)

    def _finish(acc):
        o_ref[...] = (acc + bd_ref[...].astype(jnp.float32)
                      + r_ref[...].astype(jnp.float32)).astype(o_ref.dtype)

    if single_h:
        _finish(part)
    else:
        acc_ref = maybe_acc[0]

        @pl.when(h == 0)
        def _init():
            acc_ref[...] = jnp.zeros_like(acc_ref)

        acc_ref[...] += part

        @pl.when(h == pl.num_programs(1) - 1)
        def _finalize():
            _finish(acc_ref[...])


def fused_mlp(x, mu, rstd, w_up, b_up, w_down, b_down, *, residual,
              tm=256, th=512):
    """residual + mlp_down(GELU(mlp_up(LN(x)))) in one kernel."""
    M, D = x.shape
    D2, H4 = w_up.shape
    assert D == D2 and w_down.shape == (H4, D)
    tm = _tile(M, tm, 8)
    th = _tile(H4, th, 128)
    grid = (M // tm, H4 // th)
    single_h = grid[1] == 1

    in_specs = [
        pl.BlockSpec((tm, D), lambda i, h: (i, 0)),    # x (row tile, resident)
        pl.BlockSpec((tm, 1), lambda i, h: (i, 0)),    # mu
        pl.BlockSpec((tm, 1), lambda i, h: (i, 0)),    # rstd
        pl.BlockSpec((D, th), lambda i, h: (0, h)),    # w_up (gamma folded)
        pl.BlockSpec((1, th), lambda i, h: (0, h)),    # b_up (beta folded)
        pl.BlockSpec((th, D), lambda i, h: (h, 0)),    # w_down
        pl.BlockSpec((1, D), lambda i, h: (0, 0)),     # b_down
        pl.BlockSpec((tm, D), lambda i, h: (i, 0)),    # residual
    ]
    args = [x, mu, rstd, w_up, b_up.reshape(1, H4), w_down,
            b_down.reshape(1, D), residual]

    itemsize = x.dtype.itemsize
    cost = pl.CostEstimate(
        flops=4 * M * D * H4,
        transcendentals=M * H4,
        bytes_accessed=(2 * x.size + w_up.size + w_down.size
                        + b_up.size + b_down.size + M * D) * itemsize)

    return pl.pallas_call(
        functools.partial(_fused_mlp_kernel, single_h=single_h),
        out_shape=jax.ShapeDtypeStruct((M, D), x.dtype),
        grid_spec=pltpu.PrefetchScalarGridSpec(
            num_scalar_prefetch=0,
            grid=grid,
            in_specs=in_specs,
            out_specs=pl.BlockSpec((tm, D), lambda i, h: (i, 0)),
            scratch_shapes=([] if single_h
                            else [pltpu.VMEM((tm, D), jnp.float32)]),
        ),
        compiler_params=pltpu.CompilerParams(
            dimension_semantics=("parallel", "arbitrary"),
            vmem_limit_bytes=VMEM_LIMIT),
        input_output_aliases={7: 0},            # residual aliases the output
        cost_estimate=cost,
    )(*args)


# ------------------------------ flash attention ------------------------------ #
def _flash_attn_kernel(q_ref, k_ref, v_ref, o_ref, m_sc, l_sc, acc_sc, *,
                       scale, tk, kv_resident):
    """Flash-style attention, online softmax.  The TorchCausalAttention float
    mask tril(ones) is ADDED (+1.0 on/below the diagonal) — it does NOT mask
    the future — and its per-element work is gated per tile."""
    qi = pl.program_id(1)
    ki = pl.program_id(2)
    tq = q_ref.shape[1]

    @pl.when(ki == 0)
    def _init():
        m_sc[...] = jnp.full_like(m_sc, -jnp.inf)
        l_sc[...] = jnp.zeros_like(l_sc)
        acc_sc[...] = jnp.zeros_like(acc_sc)

    if kv_resident:
        off = pl.multiple_of(ki * tk, tk)
        k_blk = k_ref[:, pl.ds(off, tk), :]
        v_blk = v_ref[:, pl.ds(off, tk), :]
    else:
        k_blk = k_ref[...]
        v_blk = v_ref[...]

    s = jnp.einsum("bqd,bkd->bqk", q_ref[...], k_blk,
                   preferred_element_type=jnp.float32) * scale

    # Additive tril(+1.0) mask, gated per tile: constant for off-band tiles,
    # iota/compare only on diagonal-band tiles.
    q_lo = qi * tq
    q_hi = q_lo + (tq - 1)
    k_lo = ki * tk
    k_hi = k_lo + (tk - 1)
    on_band = jnp.logical_and(k_lo <= q_hi, k_hi > q_lo)
    const_add = jnp.where(k_hi <= q_lo, 1.0, 0.0).astype(jnp.float32)

    def _band(sv):
        rows = lax.broadcasted_iota(jnp.int32, sv.shape, 1) + q_lo
        cols = lax.broadcasted_iota(jnp.int32, sv.shape, 2) + k_lo
        return sv + (cols <= rows).astype(jnp.float32)

    s = lax.cond(on_band, _band, lambda sv: sv + const_add, s)

    m_prev = m_sc[...]
    m_new = jnp.maximum(m_prev, jnp.max(s, axis=-1, keepdims=True))
    alpha = jnp.exp(m_prev - m_new)
    p = jnp.exp(s - m_new)
    l_sc[...] = alpha * l_sc[...] + jnp.sum(p, axis=-1, keepdims=True)
    acc_sc[...] = alpha * acc_sc[...] + jnp.einsum(
        "bqk,bkd->bqd", p.astype(v_blk.dtype), v_blk,
        preferred_element_type=jnp.float32)
    m_sc[...] = m_new

    @pl.when(ki == pl.num_programs(2) - 1)
    def _finalize():
        # exact reciprocal: approx=True (~1e-3 rel err) would break the 1e-4 check
        o_ref[...] = (acc_sc[...] * pl.reciprocal(l_sc[...], approx=False)
                      ).astype(o_ref.dtype)


def flash_attention(q, k, v, *, scale, tq=256, tk=512,
                    kv_resident_budget=8 << 20):
    """q, k, v: (B*H, T, dh) -> (B*H, T, dh).  K/V are kept VMEM-resident per
    head when they fit (cuts HBM K/V reads by ~q_tiles x)."""
    BH, T, dh = q.shape
    tq = _tile(T, tq, 8)
    tk = _tile(T, tk, 128)
    # K + V, conservatively assuming 2 pipeline buffers each.
    kv_resident = (2 * 2 * T * dh * q.dtype.itemsize) <= kv_resident_budget
    grid = (BH, T // tq, T // tk)

    if kv_resident:
        kv_block = (1, T, dh)
        kv_map = lambda b, qi, ki: (b, 0, 0)      # same block across qi/ki -> resident
    else:
        kv_block = (1, tk, dh)
        kv_map = lambda b, qi, ki: (b, ki, 0)

    kv_reads = 2 * BH * T * dh * (1 if kv_resident else T // tq)
    cost = pl.CostEstimate(
        flops=4 * BH * T * T * dh,
        transcendentals=BH * T * T,
        bytes_accessed=(2 * BH * T * dh + kv_reads) * q.dtype.itemsize)

    return pl.pallas_call(
        functools.partial(_flash_attn_kernel, scale=scale, tk=tk,
                          kv_resident=kv_resident),
        out_shape=jax.ShapeDtypeStruct((BH, T, dh), q.dtype),
        grid_spec=pltpu.PrefetchScalarGridSpec(
            num_scalar_prefetch=0,
            grid=grid,
            in_specs=[pl.BlockSpec((1, tq, dh), lambda b, qi, ki: (b, qi, 0)),
                      pl.BlockSpec(kv_block, kv_map),
                      pl.BlockSpec(kv_block, kv_map)],
            out_specs=pl.BlockSpec((1, tq, dh), lambda b, qi, ki: (b, qi, 0)),
            scratch_shapes=[pltpu.VMEM((1, tq, 1), jnp.float32),
                            pltpu.VMEM((1, tq, 1), jnp.float32),
                            pltpu.VMEM((1, tq, dh), jnp.float32)],
        ),
        compiler_params=pltpu.CompilerParams(
            dimension_semantics=("parallel", "parallel", "arbitrary"),
            vmem_limit_bytes=VMEM_LIMIT),
        cost_estimate=cost,
    )(q, k, v)


# ------------------------------ GPTBlock forward ----------------------------- #
def gpt_block_forward(x, kparams, n_heads, key_padding_mask=None):
    # key_padding_mask is ignored by TorchCausalAttention.forward (exact semantics).
    del key_padding_mask
    B, T, D = x.shape
    H = n_heads
    dh = D // H
    x2 = x.reshape(B * T, D)

    # ln_1 stats pre-pass; gamma/beta are folded into the QKV weights/bias.
    mu1, rstd1 = ln_stats(x2)
    qkv = linear(x2, kparams["in_proj_w_t"], kparams["in_proj_b"],
                 mu=mu1, rstd=rstd1)                       # (B*T, 3D)

    # TODO(synk): when dh % 128 == 0, read q/k/v straight out of the (B*T, 3D)
    # buffer via the attention in_specs index_map (column block = proj*D + h*dh)
    # and write the output into a (B*T, D) buffer (lane-dense store), removing
    # these two XLA transposes; at dh<128 the (8,128) block rules forbid it.
    qkv = qkv.reshape(B, T, 3, H, dh).transpose(2, 0, 3, 1, 4).reshape(3, B * H, T, dh)
    attn = flash_attention(qkv[0], qkv[1], qkv[2], scale=1.0 / math.sqrt(dh))
    attn = attn.reshape(B, H, T, dh).transpose(0, 2, 1, 3).reshape(B * T, D)

    # out_proj + residual add (resid_attn_dropout = identity in eval)
    x2 = linear(attn, kparams["out_proj_w_t"], kparams["out_proj_b"], residual=x2)

    # ln_2 stats, then fused mlp_up(+GELU)+mlp_down + residual (hidden stays in VMEM)
    mu2, rstd2 = ln_stats(x2)
    x2 = fused_mlp(x2, mu2, rstd2,
                   kparams["mlp_up_w_t"], kparams["mlp_up_b"],
                   kparams["mlp_down_w_t"], kparams["mlp_down_b"],
                   residual=x2)

    return x2.reshape(B, T, D)


# ------------------------- pure-JAX reference (check) ------------------------ #
def reference_forward(x, p, n_heads):
    B, T, D = x.shape
    H, dh = n_heads, D // n_heads

    def ln(t, g, b):
        mu = t.mean(-1, keepdims=True)
        var = ((t - mu) ** 2).mean(-1, keepdims=True)
        return (t - mu) / jnp.sqrt(var + LN_EPS) * g + b

    a = ln(x, p["ln1_g"], p["ln1_b"])
    qkv = a @ p["in_proj_w"].T + p["in_proj_b"]
    q, k, v = jnp.split(qkv, 3, axis=-1)

    def heads(t):
        return t.reshape(B, T, H, dh).transpose(0, 2, 1, 3)

    q, k, v = heads(q), heads(k), heads(v)
    s = (q / math.sqrt(dh)) @ k.transpose(0, 1, 3, 2) + p["attn_mask"]
    o = (jax.nn.softmax(s, axis=-1) @ v).transpose(0, 2, 1, 3).reshape(B, T, D)
    x = x + (o @ p["out_proj_w"].T + p["out_proj_b"])
    m = ln(x, p["ln2_g"], p["ln2_b"])
    h = jax.nn.gelu(m @ p["mlp_up_w"].T + p["mlp_up_b"], approximate=False)
    return x + (h @ p["mlp_down_w"].T + p["mlp_down_b"])


# ----------------------------------- params ---------------------------------- #
def init_params(key, d_model, mlp_ratio, max_seq_len):
    D = d_model
    ks = jax.random.split(key, 6)

    def w(k, shape, fan_in):
        bound = 1.0 / math.sqrt(fan_in)
        return jax.random.uniform(k, shape, jnp.float32, -bound, bound)

    return {
        "ln1_g": jnp.ones((D,), jnp.float32),
        "ln1_b": jnp.zeros((D,), jnp.float32),
        "in_proj_w": w(ks[0], (3 * D, D), D),
        "in_proj_b": jnp.zeros((3 * D,), jnp.float32),   # PyTorch zero-inits in_proj_bias
        "out_proj_w": w(ks[1], (D, D), D),
        "out_proj_b": jnp.zeros((D,), jnp.float32),
        "ln2_g": jnp.ones((D,), jnp.float32),
        "ln2_b": jnp.zeros((D,), jnp.float32),
        "mlp_up_w": w(ks[2], (mlp_ratio * D, D), D),
        "mlp_up_b": w(ks[3], (mlp_ratio * D,), D),
        "mlp_down_w": w(ks[4], (D, mlp_ratio * D), mlp_ratio * D),
        "mlp_down_b": w(ks[5], (D,), mlp_ratio * D),
        # TorchCausalAttention buffer (reference only; kernel generates it in-VPU).
        "attn_mask": jnp.tril(jnp.ones((max_seq_len, max_seq_len), jnp.float32)),
    }


def prepare_kernel_params(p, compute_dtype=jnp.float32):
    """One-time weight prep: (K, N) layout, LN gamma folded into the weight
    columns and beta@W into the bias, optional bf16 cast (f32 biases kept)."""
    in_w_t = p["in_proj_w"].T           # (D, 3D)
    up_w_t = p["mlp_up_w"].T            # (D, 4D)
    return {
        "in_proj_w_t": (p["ln1_g"][:, None] * in_w_t).astype(compute_dtype),
        "in_proj_b": (p["in_proj_b"] + p["ln1_b"] @ in_w_t).astype(jnp.float32),
        "out_proj_w_t": p["out_proj_w"].T.astype(compute_dtype),
        "out_proj_b": p["out_proj_b"].astype(jnp.float32),
        "mlp_up_w_t": (p["ln2_g"][:, None] * up_w_t).astype(compute_dtype),
        "mlp_up_b": (p["mlp_up_b"] + p["ln2_b"] @ up_w_t).astype(jnp.float32),
        "mlp_down_w_t": p["mlp_down_w"].T.astype(compute_dtype),
        "mlp_down_b": p["mlp_down_b"].astype(jnp.float32),
    }


if __name__ == "__main__":
    # cfg: d_model=32, n_heads=4, mlp_ratio=4, max_seq_len=8, attn_impl='torch',
    # attn_pdrop=resid_pdrop=0 (eval -> dropout identity anyway)
    B, T, D, H, MLP_RATIO = 2, 8, 32, 4, 4

    key = jax.random.PRNGKey(0)
    kx, kp = jax.random.split(key)
    x = jax.random.normal(kx, (B, T, D), jnp.float32)
    params = init_params(kp, D, MLP_RATIO, T)
    # compute_dtype=jnp.bfloat16 halves HBM/VMEM traffic and hits MXU bf16 peak,
    # but would not pass the 1e-4 check below; keep f32 for the validation run.
    kparams = prepare_kernel_params(params, compute_dtype=jnp.float32)

    fwd = jax.jit(functools.partial(gpt_block_forward, n_heads=H))
    out = jax.block_until_ready(fwd(x, kparams))

    ref = reference_forward(x, params, H)
    assert out.shape == (B, T, D)
    assert jnp.allclose(out, ref, rtol=1e-4, atol=1e-4), "mismatch vs reference"
    print("KERNEL_OK")
</pallas_src>

<mosaic_0001>
module attributes {stable_mosaic.version = 11 : i64} {
  func.func @_ln_stats_kernel(%arg0: i32, %arg1: memref<16x32xf32, #tpu.memory_space<vmem>>, %arg2: memref<16x1xf32, #tpu.memory_space<vmem>>, %arg3: memref<16x1xf32, #tpu.memory_space<vmem>>) attributes {dimension_semantics = [#tpu.dimension_semantics<parallel>], iteration_bounds = array<i64: 1>, scalar_prefetch = 0 : i64, scratch_operands = 0 : i64, tpu.core_type = #tpu.core_type<tc>, window_params = [{transform_indices = @transform_0, window_bounds = array<i64: 16, 32>}, {transform_indices = @transform_1, window_bounds = array<i64: 16, 1>}, {transform_indices = @transform_2, window_bounds = array<i64: 16, 1>}]} {
    %c0 = arith.constant 0 : index
    %c0_0 = arith.constant 0 : index
    %0 = vector.load %arg1[%c0, %c0_0] : memref<16x32xf32, #tpu.memory_space<vmem>>, vector<16x32xf32>
    %cst = arith.constant dense<0.000000e+00> : vector<16xf32>
    %1 = vector.multi_reduction <add>, %0, %cst [1] : vector<16x32xf32> to vector<16xf32>
    %2 = vector.shape_cast %1 : vector<16xf32> to vector<16x1xf32>
    %cst_1 = arith.constant 3.200000e+01 : f32
    %3 = vector.broadcast %cst_1 : f32 to vector<16x1xf32>
    %4 = arith.divf %2, %3 : vector<16x1xf32>
    %5 = vector.broadcast %4 : vector<16x1xf32> to vector<16x32xf32>
    %6 = arith.subf %0, %5 : vector<16x32xf32>
    %7 = arith.mulf %6, %6 : vector<16x32xf32>
    %cst_2 = arith.constant dense<0.000000e+00> : vector<16xf32>
    %8 = vector.multi_reduction <add>, %7, %cst_2 [1] : vector<16x32xf32> to vector<16xf32>
    %9 = vector.shape_cast %8 : vector<16xf32> to vector<16x1xf32>
    %cst_3 = arith.constant 3.200000e+01 : f32
    %10 = vector.broadcast %cst_3 : f32 to vector<16x1xf32>
    %11 = arith.divf %9, %10 : vector<16x1xf32>
    %c0_4 = arith.constant 0 : index
    %c0_5 = arith.constant 0 : index
    %12 = vector.load %arg2[%c0_4, %c0_5] : memref<16x1xf32, #tpu.memory_space<vmem>>, vector<16x1xf32>
    tpu.vector_store %arg2[%c0_4, %c0_5], %4 {strides = array<i32>} : memref<16x1xf32, #tpu.memory_space<vmem>>, vector<16x1xf32>,
    %cst_6 = arith.constant 9.99999974E-6 : f32
    %13 = vector.broadcast %cst_6 : f32 to vector<16x1xf32>
    %14 = arith.addf %11, %13 : vector<16x1xf32>
    %15 = math.rsqrt %14 : vector<16x1xf32>
    %c0_7 = arith.constant 0 : index
    %c0_8 = arith.constant 0 : index
    %16 = vector.load %arg3[%c0_7, %c0_8] : memref<16x1xf32, #tpu.memory_space<vmem>>, vector<16x1xf32>
    tpu.vector_store %arg3[%c0_7, %c0_8], %15 {strides = array<i32>} : memref<16x1xf32, #tpu.memory_space<vmem>>, vector<16x1xf32>,
    return
  }
  func.func @transform_0(%arg0: i32) -> (i32, i32) {
    %c0_i32 = arith.constant 0 : i32
    %c0_i32_0 = arith.constant 0 : i32
    return %arg0, %c0_i32 : i32, i32
  }
  func.func @transform_1(%arg0: i32) -> (i32, i32) {
    %c0_i32 = arith.constant 0 : i32
    %c0_i32_0 = arith.constant 0 : i32
    return %arg0, %c0_i32 : i32, i32
  }
  func.func @transform_2(%arg0: i32) -> (i32, i32) {
    %c0_i32 = arith.constant 0 : i32
    %c0_i32_0 = arith.constant 0 : i32
    return %arg0, %c0_i32 : i32, i32
  }
}

module attributes {stable_mosaic.version = 11 : i64} {
  func.func @_linear_kernel(%arg0: i32, %arg1: i32, %arg2: i32, %arg3: memref<16x32xf32, #tpu.memory_space<vmem>>, %arg4: memref<32x96xf32, #tpu.memory_space<vmem>>, %arg5: memref<1x96xf32, #tpu.memory_space<vmem>>, %arg6: memref<16x1xf32, #tpu.memory_space<vmem>>, %arg7: memref<16x1xf32, #tpu.memory_space<vmem>>, %arg8: memref<16x96xf32, #tpu.memory_space<vmem>>) attributes {dimension_semantics = [#tpu.dimension_semantics<parallel>, #tpu.dimension_semantics<parallel>, #tpu.dimension_semantics<arbitrary>], iteration_bounds = array<i64: 1, 1, 1>, scalar_prefetch = 0 : i64, scratch_operands = 0 : i64, tpu.core_type = #tpu.core_type<tc>, window_params = [{transform_indices = @transform_0, window_bounds = array<i64: 16, 32>}, {transform_indices = @transform_1, window_bounds = array<i64: 32, 96>}, {transform_indices = @transform_2, window_bounds = array<i64: 1, 96>}, {transform_indices = @transform_3, window_bounds = array<i64: 16, 1>}, {transform_indices = @transform_4, window_bounds = array<i64: 16, 1>}, {transform_indices = @transform_5, window_bounds = array<i64: 16, 96>}]} {
    %c0 = arith.constant 0 : index
    %c0_0 = arith.constant 0 : index
    %0 = vector.load %arg3[%c0, %c0_0] : memref<16x32xf32, #tpu.memory_space<vmem>>, vector<16x32xf32>
    %c0_1 = arith.constant 0 : index
    %c0_2 = arith.constant 0 : index
    %1 = vector.load %arg6[%c0_1, %c0_2] : memref<16x1xf32, #tpu.memory_space<vmem>>, vector<16x1xf32>
    %2 = vector.broadcast %1 : vector<16x1xf32> to vector<16x32xf32>
    %3 = arith.subf %0, %2 : vector<16x32xf32>
    %c0_3 = arith.constant 0 : index
    %c0_4 = arith.constant 0 : index
    %4 = vector.load %arg7[%c0_3, %c0_4] : memref<16x1xf32, #tpu.memory_space<vmem>>, vector<16x1xf32>
    %5 = vector.broadcast %4 : vector<16x1xf32> to vector<16x32xf32>
    %6 = arith.mulf %3, %5 : vector<16x32xf32>
    %c0_5 = arith.constant 0 : index
    %c0_6 = arith.constant 0 : index
    %7 = vector.load %arg4[%c0_5, %c0_6] : memref<32x96xf32, #tpu.memory_space<vmem>>, vector<32x96xf32>
    %cst = arith.constant dense<0.000000e+00> : vector<16x96xf32>
    %8 = tpu.matmul %6, %7, %cst {dimension_numbers = #tpu.dot_dimension_numbers<[1], [0], [0], [1], [0, 0, 1, 1], [], []>} : vector<16x32xf32>, vector<32x96xf32>, vector<16x96xf32> -> vector<16x96xf32>
    %c0_7 = arith.constant 0 : index
    %c0_8 = arith.constant 0 : index
    %9 = vector.load %arg5[%c0_7, %c0_8] : memref<1x96xf32, #tpu.memory_space<vmem>>, vector<1x96xf32>
    %10 = vector.broadcast %9 : vector<1x96xf32> to vector<16x96xf32>
    %11 = arith.addf %8, %10 : vector<16x96xf32>
    %c0_9 = arith.constant 0 : index
    %c0_10 = arith.constant 0 : index
    %12 = vector.load %arg8[%c0_9, %c0_10] : memref<16x96xf32, #tpu.memory_space<vmem>>, vector<16x96xf32>
    tpu.vector_store %arg8[%c0_9, %c0_10], %11 {strides = array<i32>} : memref<16x96xf32, #tpu.memory_space<vmem>>, vector<16x96xf32>,
    return
  }
  func.func @transform_0(%arg0: i32, %arg1: i32, %arg2: i32) -> (i32, i32) {
    %c0_i32 = arith.constant 0 : i32
    return %arg0, %arg2 : i32, i32
  }
  func.func @transform_1(%arg0: i32, %arg1: i32, %arg2: i32) -> (i32, i32) {
    %c0_i32 = arith.constant 0 : i32
    return %arg2, %arg1 : i32, i32
  }
  func.func @transform_2(%arg0: i32, %arg1: i32, %arg2: i32) -> (i32, i32) {
    %c0_i32 = arith.constant 0 : i32
    %c0_i32_0 = arith.constant 0 : i32
    return %c0_i32, %arg1 : i32, i32
  }
  func.func @transform_3(%arg0: i32, %arg1: i32, %arg2: i32) -> (i32, i32) {
    %c0_i32 = arith.constant 0 : i32
    %c0_i32_0 = arith.constant 0 : i32
    return %arg0, %c0_i32 : i32, i32
  }
  func.func @transform_4(%arg0: i32, %arg1: i32, %arg2: i32) -> (i32, i32) {
    %c0_i32 = arith.constant 0 : i32
    %c0_i32_0 = arith.constant 0 : i32
    return %arg0, %c0_i32 : i32, i32
  }
  func.func @transform_5(%arg0: i32, %arg1: i32, %arg2: i32) -> (i32, i32) {
    %c0_i32 = arith.constant 0 : i32
    return %arg0, %arg1 : i32, i32
  }
}

module attributes {stable_mosaic.version = 11 : i64} {
  func.func @_flash_attn_kernel(%arg0: i32, %arg1: i32, %arg2: i32, %arg3: memref<1x8x8xf32, #tpu.memory_space<vmem>>, %arg4: memref<1x8x8xf32, #tpu.memory_space<vmem>>, %arg5: memref<1x8x8xf32, #tpu.memory_space<vmem>>, %arg6: memref<1x8x8xf32, #tpu.memory_space<vmem>>, %arg7: memref<1x8x1xf32, #tpu.memory_space<vmem>>, %arg8: memref<1x8x1xf32, #tpu.memory_space<vmem>>, %arg9: memref<1x8x8xf32, #tpu.memory_space<vmem>>) attributes {dimension_semantics = [#tpu.dimension_semantics<parallel>, #tpu.dimension_semantics<parallel>, #tpu.dimension_semantics<arbitrary>], iteration_bounds = array<i64: 8, 1, 1>, scalar_prefetch = 0 : i64, scratch_operands = 3 : i64, tpu.core_type = #tpu.core_type<tc>, window_params = [{transform_indices = @transform_0, window_bounds = array<i64: 1, 8, 8>}, {transform_indices = @transform_1, window_bounds = array<i64: 1, 8, 8>}, {transform_indices = @transform_2, window_bounds = array<i64: 1, 8, 8>}, {transform_indices = @transform_3, window_bounds = array<i64: 1, 8, 8>}]} {
    %c0_i32 = arith.constant 0 : i32
    %0 = arith.cmpi eq, %arg2, %c0_i32 : i32
    %1 = arith.extui %0 : i1 to i32
    %c0_i32_0 = arith.constant 0 : i32
    %2 = arith.cmpi ne, %1, %c0_i32_0 : i32
    scf.if %2 {
      %cst_37 = arith.constant 0xFF800000 : f32
      %50 = vector.broadcast %cst_37 : f32 to vector<1x8x1xf32>
      %c0_38 = arith.constant 0 : index
      %c0_39 = arith.constant 0 : index
      %c0_40 = arith.constant 0 : index
      %51 = vector.load %arg7[%c0_38, %c0_39, %c0_40] : memref<1x8x1xf32, #tpu.memory_space<vmem>>, vector<1x8x1xf32>
      tpu.vector_store %arg7[%c0_38, %c0_39, %c0_40], %50 {strides = array<i32>} : memref<1x8x1xf32, #tpu.memory_space<vmem>>, vector<1x8x1xf32>,
      %cst_41 = arith.constant 0.000000e+00 : f32
      %52 = vector.broadcast %cst_41 : f32 to vector<1x8x1xf32>
      %c0_42 = arith.constant 0 : index
      %c0_43 = arith.constant 0 : index
      %c0_44 = arith.constant 0 : index
      %53 = vector.load %arg8[%c0_42, %c0_43, %c0_44] : memref<1x8x1xf32, #tpu.memory_space<vmem>>, vector<1x8x1xf32>
      tpu.vector_store %arg8[%c0_42, %c0_43, %c0_44], %52 {strides = array<i32>} : memref<1x8x1xf32, #tpu.memory_space<vmem>>, vector<1x8x1xf32>,
      %cst_45 = arith.constant 0.000000e+00 : f32
      %54 = vector.broadcast %cst_45 : f32 to vector<1x8x8xf32>
      %c0_46 = arith.constant 0 : index
      %c0_47 = arith.constant 0 : index
      %c0_48 = arith.constant 0 : index
      %55 = vector.load %arg9[%c0_46, %c0_47, %c0_48] : memref<1x8x8xf32, #tpu.memory_space<vmem>>, vector<1x8x8xf32>
      tpu.vector_store %arg9[%c0_46, %c0_47, %c0_48], %54 {strides = array<i32>} : memref<1x8x8xf32, #tpu.memory_space<vmem>>, vector<1x8x8xf32>,
    } else {
    }
    %c8_i32 = arith.constant 8 : i32
    %3 = arith.muli %arg2, %c8_i32 : i32
    %4 = tpu.assume_multiple %3, 8 : i32
    %c0 = arith.constant 0 : index
    %5 = arith.index_cast %4 : i32 to index
    %c0_1 = arith.constant 0 : index
    %6 = vector.load %arg4[%c0, %5, %c0_1] : memref<1x8x8xf32, #tpu.memory_space<vmem>>, vector<1x8x8xf32>
    %c0_2 = arith.constant 0 : index
    %7 = arith.index_cast %4 : i32 to index
    %c0_3 = arith.constant 0 : index
    %8 = vector.load %arg5[%c0_2, %7, %c0_3] : memref<1x8x8xf32, #tpu.memory_space<vmem>>, vector<1x8x8xf32>
    %c0_4 = arith.constant 0 : index
    %c0_5 = arith.constant 0 : index
    %c0_6 = arith.constant 0 : index
    %9 = vector.load %arg3[%c0_4, %c0_5, %c0_6] : memref<1x8x8xf32, #tpu.memory_space<vmem>>, vector<1x8x8xf32>
    "tpu.trace_start"() <{level = 10 : i32, message = "bqd,bkd->bqk"}> : () -> ()
    %cst = arith.constant dense<0.000000e+00> : vector<1x8x8xf32>
    %10 = tpu.matmul %9, %6, %cst {dimension_numbers = #tpu.dot_dimension_numbers<[2], [2], [1], [1], [0, 0, 0, 1, 1, 1], [0], [0]>} : vector<1x8x8xf32>, vector<1x8x8xf32>, vector<1x8x8xf32> -> vector<1x8x8xf32>
    "tpu.trace_stop"() : () -> ()
    %cst_7 = arith.constant 0.353553385 : f32
    %11 = vector.broadcast %cst_7 : f32 to vector<1x8x8xf32>
    %12 = arith.mulf %10, %11 : vector<1x8x8xf32>
    %c8_i32_8 = arith.constant 8 : i32
    %13 = arith.muli %arg1, %c8_i32_8 : i32
    %c7_i32 = arith.constant 7 : i32
    %14 = arith.addi %13, %c7_i32 : i32
    %c8_i32_9 = arith.constant 8 : i32
    %15 = arith.muli %arg2, %c8_i32_9 : i32
    %c7_i32_10 = arith.constant 7 : i32
    %16 = arith.addi %15, %c7_i32_10 : i32
    %17 = arith.cmpi sle, %15, %14 : i32
    %18 = arith.cmpi sgt, %16, %13 : i32
    %19 = arith.andi %17, %18 : i1
    %20 = arith.cmpi sle, %16, %13 : i32
    %cst_11 = arith.constant 1.000000e+00 : f32
    %cst_12 = arith.constant 0.000000e+00 : f32
    %21 = arith.select %20, %cst_11, %cst_12 : f32
    %22 = arith.extui %19 : i1 to i32
    %c0_i32_13 = arith.constant 0 : i32
    %23 = arith.cmpi ne, %22, %c0_i32_13 : i32
    %24 = scf.if %23 -> (vector<1x8x8xf32>) {
      %50 = tpu.iota {dimensions = array<i32: 1>} : vector<1x8x8xi32>
      %51 = vector.broadcast %13 : i32 to vector<1x8x8xi32>
      %52 = arith.addi %50, %51 : vector<1x8x8xi32>
      %53 = tpu.iota {dimensions = array<i32: 2>} : vector<1x8x8xi32>
      %54 = vector.broadcast %15 : i32 to vector<1x8x8xi32>
      %55 = arith.addi %53, %54 : vector<1x8x8xi32>
      %56 = arith.cmpi sle, %55, %52 : vector<1x8x8xi32>
      %57 = arith.extui %56 : vector<1x8x8xi1> to vector<1x8x8xi32>
      %58 = arith.sitofp %57 : vector<1x8x8xi32> to vector<1x8x8xf32>
      %59 = arith.addf %12, %58 : vector<1x8x8xf32>
      scf.yield %59 : vector<1x8x8xf32>
    } else {
      %50 = vector.broadcast %21 : f32 to vector<1x8x8xf32>
      %51 = arith.addf %12, %50 : vector<1x8x8xf32>
      scf.yield %51 : vector<1x8x8xf32>
    }
    %c0_14 = arith.constant 0 : index
    %c0_15 = arith.constant 0 : index
    %c0_16 = arith.constant 0 : index
    %25 = vector.load %arg7[%c0_14, %c0_15, %c0_16] : memref<1x8x1xf32, #tpu.memory_space<vmem>>, vector<1x8x1xf32>
    %cst_17 = arith.constant dense<0xFF800000> : vector<1x8xf32>
    %26 = vector.multi_reduction <maximumf>, %24, %cst_17 [2] : vector<1x8x8xf32> to vector<1x8xf32>
    %27 = vector.shape_cast %26 : vector<1x8xf32> to vector<1x8x1xf32>
    %28 = arith.maximumf %25, %27 : vector<1x8x1xf32>
    %29 = arith.subf %25, %28 : vector<1x8x1xf32>
    %30 = math.exp %29 : vector<1x8x1xf32>
    %31 = vector.broadcast %28 : vector<1x8x1xf32> to vector<1x8x8xf32>
    %32 = arith.subf %24, %31 : vector<1x8x8xf32>
    %33 = math.exp %32 : vector<1x8x8xf32>
    %c0_18 = arith.constant 0 : index
    %c0_19 = arith.constant 0 : index
    %c0_20 = arith.constant 0 : index
    %34 = vector.load %arg8[%c0_18, %c0_19, %c0_20] : memref<1x8x1xf32, #tpu.memory_space<vmem>>, vector<1x8x1xf32>
    %35 = arith.mulf %30, %34 : vector<1x8x1xf32>
    %cst_21 = arith.constant dense<0.000000e+00> : vector<1x8xf32>
    %36 = vector.multi_reduction <add>, %33, %cst_21 [2] : vector<1x8x8xf32> to vector<1x8xf32>
    %37 = vector.shape_cast %36 : vector<1x8xf32> to vector<1x8x1xf32>
    %38 = arith.addf %35, %37 : vector<1x8x1xf32>
    %c0_22 = arith.constant 0 : index
    %c0_23 = arith.constant 0 : index
    %c0_24 = arith.constant 0 : index
    %39 = vector.load %arg8[%c0_22, %c0_23, %c0_24] : memref<1x8x1xf32, #tpu.memory_space<vmem>>, vector<1x8x1xf32>
    tpu.vector_store %arg8[%c0_22, %c0_23, %c0_24], %38 {strides = array<i32>} : memref<1x8x1xf32, #tpu.memory_space<vmem>>, vector<1x8x1xf32>,
    %c0_25 = arith.constant 0 : index
    %c0_26 = arith.constant 0 : index
    %c0_27 = arith.constant 0 : index
    %40 = vector.load %arg9[%c0_25, %c0_26, %c0_27] : memref<1x8x8xf32, #tpu.memory_space<vmem>>, vector<1x8x8xf32>
    %41 = vector.broadcast %30 : vector<1x8x1xf32> to vector<1x8x8xf32>
    %42 = arith.mulf %41, %40 : vector<1x8x8xf32>
    "tpu.trace_start"() <{level = 10 : i32, message = "bqk,bkd->bqd"}> : () -> ()
    %cst_28 = arith.constant dense<0.000000e+00> : vector<1x8x8xf32>
    %43 = tpu.matmul %33, %8, %cst_28 {dimension_numbers = #tpu.dot_dimension_numbers<[2], [1], [1], [2], [0, 0, 0, 1, 1, 2], [0], [0]>} : vector<1x8x8xf32>, vector<1x8x8xf32>, vector<1x8x8xf32> -> vector<1x8x8xf32>
    "tpu.trace_stop"() : () -> ()
    %44 = arith.addf %42, %43 : vector<1x8x8xf32>
    %c0_29 = arith.constant 0 : index
    %c0_30 = arith.constant 0 : index
    %c0_31 = arith.constant 0 : index
    %45 = vector.load %arg9[%c0_29, %c0_30, %c0_31] : memref<1x8x8xf32, #tpu.memory_space<vmem>>, vector<1x8x8xf32>
    tpu.vector_store %arg9[%c0_29, %c0_30, %c0_31], %44 {strides = array<i32>} : memref<1x8x8xf32, #tpu.memory_space<vmem>>, vector<1x8x8xf32>,
    %c0_32 = arith.constant 0 : index
    %c0_33 = arith.constant 0 : index
    %c0_34 = arith.constant 0 : index
    %46 = vector.load %arg7[%c0_32, %c0_33, %c0_34] : memref<1x8x1xf32, #tpu.memory_space<vmem>>, vector<1x8x1xf32>
    tpu.vector_store %arg7[%c0_32, %c0_33, %c0_34], %28 {strides = array<i32>} : memref<1x8x1xf32, #tpu.memory_space<vmem>>, vector<1x8x1xf32>,
    %c0_i32_35 = arith.constant 0 : i32
    %47 = arith.cmpi eq, %arg2, %c0_i32_35 : i32
    %48 = arith.extui %47 : i1 to i32
    %c0_i32_36 = arith.constant 0 : i32
    %49 = arith.cmpi ne, %48, %c0_i32_36 : i32
    scf.if %49 {
      %c0_37 = arith.constant 0 : index
      %c0_38 = arith.constant 0 : index
      %c0_39 = arith.constant 0 : index
      %50 = vector.load %arg9[%c0_37, %c0_38, %c0_39] : memref<1x8x8xf32, #tpu.memory_space<vmem>>, vector<1x8x8xf32>
      %c0_40 = arith.constant 0 : index
      %c0_41 = arith.constant 0 : index
      %c0_42 = arith.constant 0 : index
      %51 = vector.load %arg8[%c0_40, %c0_41, %c0_42] : memref<1x8x1xf32, #tpu.memory_space<vmem>>, vector<1x8x1xf32>
      %52 = tpu.reciprocal %51 : vector<1x8x1xf32> -> vector<1x8x1xf32>
      %53 = vector.broadcast %52 : vector<1x8x1xf32> to vector<1x8x8xf32>
      %54 = arith.mulf %50, %53 : vector<1x8x8xf32>
      %c0_43 = arith.constant 0 : index
      %c0_44 = arith.constant 0 : index
      %c0_45 = arith.constant 0 : index
      %55 = vector.load %arg6[%c0_43, %c0_44, %c0_45] : memref<1x8x8xf32, #tpu.memory_space<vmem>>, vector<1x8x8xf32>
      tpu.vector_store %arg6[%c0_43, %c0_44, %c0_45], %54 {strides = array<i32>} : memref<1x8x8xf32, #tpu.memory_space<vmem>>, vector<1x8x8xf32>,
    } else {
    }
    return
  }
  func.func @transform_0(%arg0: i32, %arg1: i32, %arg2: i32) -> (i32, i32, i32) {
    %c0_i32 = arith.constant 0 : i32
    %c0_i32_0 = arith.constant 0 : i32
    return %arg0, %arg1, %c0_i32 : i32, i32, i32
  }
  func.func @transform_1(%arg0: i32, %arg1: i32, %arg2: i32) -> (i32, i32, i32) {
    %c0_i32 = arith.constant 0 : i32
    %c0_i32_0 = arith.constant 0 : i32
    %c0_i32_1 = arith.constant 0 : i32
    return %arg0, %c0_i32, %c0_i32_0 : i32, i32, i32
  }
  func.func @transform_2(%arg0: i32, %arg1: i32, %arg2: i32) -> (i32, i32, i32) {
    %c0_i32 = arith.constant 0 : i32
    %c0_i32_0 = arith.constant 0 : i32
    %c0_i32_1 = arith.constant 0 : i32
    return %arg0, %c0_i32, %c0_i32_0 : i32, i32, i32
  }
  func.func @transform_3(%arg0: i32, %arg1: i32, %arg2: i32) -> (i32, i32, i32) {
    %c0_i32 = arith.constant 0 : i32
    %c0_i32_0 = arith.constant 0 : i32
    return %arg0, %arg1, %c0_i32 : i32, i32, i32
  }
}

module attributes {stable_mosaic.version = 11 : i64} {
  func.func @_linear_kernel(%arg0: i32, %arg1: i32, %arg2: i32, %arg3: memref<16x32xf32, #tpu.memory_space<vmem>>, %arg4: memref<32x32xf32, #tpu.memory_space<vmem>>, %arg5: memref<1x32xf32, #tpu.memory_space<vmem>>, %arg6: memref<16x32xf32, #tpu.memory_space<vmem>>, %arg7: memref<16x32xf32, #tpu.memory_space<vmem>>) attributes {dimension_semantics = [#tpu.dimension_semantics<parallel>, #tpu.dimension_semantics<parallel>, #tpu.dimension_semantics<arbitrary>], iteration_bounds = array<i64: 1, 1, 1>, scalar_prefetch = 0 : i64, scratch_operands = 0 : i64, tpu.core_type = #tpu.core_type<tc>, window_params = [{transform_indices = @transform_0, window_bounds = array<i64: 16, 32>}, {transform_indices = @transform_1, window_bounds = array<i64: 32, 32>}, {transform_indices = @transform_2, window_bounds = array<i64: 1, 32>}, {transform_indices = @transform_3, window_bounds = array<i64: 16, 32>}, {transform_indices = @transform_4, window_bounds = array<i64: 16, 32>}]} {
    %c0 = arith.constant 0 : index
    %c0_0 = arith.constant 0 : index
    %0 = vector.load %arg3[%c0, %c0_0] : memref<16x32xf32, #tpu.memory_space<vmem>>, vector<16x32xf32>
    %c0_1 = arith.constant 0 : index
    %c0_2 = arith.constant 0 : index
    %1 = vector.load %arg4[%c0_1, %c0_2] : memref<32x32xf32, #tpu.memory_space<vmem>>, vector<32x32xf32>
    %cst = arith.constant dense<0.000000e+00> : vector<16x32xf32>
    %2 = tpu.matmul %0, %1, %cst {dimension_numbers = #tpu.dot_dimension_numbers<[1], [0], [0], [1], [0, 0, 1, 1], [], []>} : vector<16x32xf32>, vector<32x32xf32>, vector<16x32xf32> -> vector<16x32xf32>
    %c0_3 = arith.constant 0 : index
    %c0_4 = arith.constant 0 : index
    %3 = vector.load %arg5[%c0_3, %c0_4] : memref<1x32xf32, #tpu.memory_space<vmem>>, vector<1x32xf32>
    %4 = vector.broadcast %3 : vector<1x32xf32> to vector<16x32xf32>
    %5 = arith.addf %2, %4 : vector<16x32xf32>
    %c0_5 = arith.constant 0 : index
    %c0_6 = arith.constant 0 : index
    %6 = vector.load %arg6[%c0_5, %c0_6] : memref<16x32xf32, #tpu.memory_space<vmem>>, vector<16x32xf32>
    %7 = arith.addf %5, %6 : vector<16x32xf32>
    %c0_7 = arith.constant 0 : index
    %c0_8 = arith.constant 0 : index
    %8 = vector.load %arg7[%c0_7, %c0_8] : memref<16x32xf32, #tpu.memory_space<vmem>>, vector<16x32xf32>
    tpu.vector_store %arg7[%c0_7, %c0_8], %7 {strides = array<i32>} : memref<16x32xf32, #tpu.memory_space<vmem>>, vector<16x32xf32>,
    return
  }
  func.func @transform_0(%arg0: i32, %arg1: i32, %arg2: i32) -> (i32, i32) {
    %c0_i32 = arith.constant 0 : i32
    return %arg0, %arg2 : i32, i32
  }
  func.func @transform_1(%arg0: i32, %arg1: i32, %arg2: i32) -> (i32, i32) {
    %c0_i32 = arith.constant 0 : i32
    return %arg2, %arg1 : i32, i32
  }
  func.func @transform_2(%arg0: i32, %arg1: i32, %arg2: i32) -> (i32, i32) {
    %c0_i32 = arith.constant 0 : i32
    %c0_i32_0 = arith.constant 0 : i32
    return %c0_i32, %arg1 : i32, i32
  }
  func.func @transform_3(%arg0: i32, %arg1: i32, %arg2: i32) -> (i32, i32) {
    %c0_i32 = arith.constant 0 : i32
    return %arg0, %arg1 : i32, i32
  }
  func.func @transform_4(%arg0: i32, %arg1: i32, %arg2: i32) -> (i32, i32) {
    %c0_i32 = arith.constant 0 : i32
    return %arg0, %arg1 : i32, i32
  }
}

module attributes {stable_mosaic.version = 11 : i64} {
  func.func @_fused_mlp_kernel(%arg0: i32, %arg1: i32, %arg2: memref<16x32xf32, #tpu.memory_space<vmem>>, %arg3: memref<16x1xf32, #tpu.memory_space<vmem>>, %arg4: memref<16x1xf32, #tpu.memory_space<vmem>>, %arg5: memref<32x128xf32, #tpu.memory_space<vmem>>, %arg6: memref<1x128xf32, #tpu.memory_space<vmem>>, %arg7: memref<128x32xf32, #tpu.memory_space<vmem>>, %arg8: memref<1x32xf32, #tpu.memory_space<vmem>>, %arg9: memref<16x32xf32, #tpu.memory_space<vmem>>, %arg10: memref<16x32xf32, #tpu.memory_space<vmem>>) attributes {dimension_semantics = [#tpu.dimension_semantics<parallel>, #tpu.dimension_semantics<arbitrary>], iteration_bounds = array<i64: 1, 1>, scalar_prefetch = 0 : i64, scratch_operands = 0 : i64, tpu.core_type = #tpu.core_type<tc>, window_params = [{transform_indices = @transform_0, window_bounds = array<i64: 16, 32>}, {transform_indices = @transform_1, window_bounds = array<i64: 16, 1>}, {transform_indices = @transform_2, window_bounds = array<i64: 16, 1>}, {transform_indices = @transform_3, window_bounds = array<i64: 32, 128>}, {transform_indices = @transform_4, window_bounds = array<i64: 1, 128>}, {transform_indices = @transform_5, window_bounds = array<i64: 128, 32>}, {pipeline_mode = #tpu.pipeline_mode<synchronous>, transform_indices = @transform_6, window_bounds = array<i64: 1, 32>}, {transform_indices = @transform_7, window_bounds = array<i64: 16, 32>}, {transform_indices = @transform_8, window_bounds = array<i64: 16, 32>}]} {
    %c0 = arith.constant 0 : index
    %c0_0 = arith.constant 0 : index
    %0 = vector.load %arg2[%c0, %c0_0] : memref<16x32xf32, #tpu.memory_space<vmem>>, vector<16x32xf32>
    %c0_1 = arith.constant 0 : index
    %c0_2 = arith.constant 0 : index
    %1 = vector.load %arg3[%c0_1, %c0_2] : memref<16x1xf32, #tpu.memory_space<vmem>>, vector<16x1xf32>
    %2 = vector.broadcast %1 : vector<16x1xf32> to vector<16x32xf32>
    %3 = arith.subf %0, %2 : vector<16x32xf32>
    %c0_3 = arith.constant 0 : index
    %c0_4 = arith.constant 0 : index
    %4 = vector.load %arg4[%c0_3, %c0_4] : memref<16x1xf32, #tpu.memory_space<vmem>>, vector<16x1xf32>
    %5 = vector.broadcast %4 : vector<16x1xf32> to vector<16x32xf32>
    %6 = arith.mulf %3, %5 : vector<16x32xf32>
    %c0_5 = arith.constant 0 : index
    %c0_6 = arith.constant 0 : index
    %7 = vector.load %arg5[%c0_5, %c0_6] : memref<32x128xf32, #tpu.memory_space<vmem>>, vector<32x128xf32>
    %cst = arith.constant dense<0.000000e+00> : vector<16x128xf32>
    %8 = tpu.matmul %6, %7, %cst {dimension_numbers = #tpu.dot_dimension_numbers<[1], [0], [0], [1], [0, 0, 1, 1], [], []>} : vector<16x32xf32>, vector<32x128xf32>, vector<16x128xf32> -> vector<16x128xf32>
    %c0_7 = arith.constant 0 : index
    %c0_8 = arith.constant 0 : index
    %9 = vector.load %arg6[%c0_7, %c0_8] : memref<1x128xf32, #tpu.memory_space<vmem>>, vector<1x128xf32>
    %10 = vector.broadcast %9 : vector<1x128xf32> to vector<16x128xf32>
    %11 = arith.addf %8, %10 : vector<16x128xf32>
    %cst_9 = arith.constant 5.000000e-01 : f32
    %12 = vector.broadcast %cst_9 : f32 to vector<16x128xf32>
    %13 = arith.mulf %12, %11 : vector<16x128xf32>
    %cst_10 = arith.constant 0.707106769 : f32
    %14 = vector.broadcast %cst_10 : f32 to vector<16x128xf32>
    %15 = arith.mulf %11, %14 : vector<16x128xf32>
    %16 = math.erf %15 : vector<16x128xf32>
    %cst_11 = arith.constant 1.000000e+00 : f32
    %17 = vector.broadcast %cst_11 : f32 to vector<16x128xf32>
    %18 = arith.addf %17, %16 : vector<16x128xf32>
    %19 = arith.mulf %13, %18 : vector<16x128xf32>
    %c0_12 = arith.constant 0 : index
    %c0_13 = arith.constant 0 : index
    %20 = vector.load %arg7[%c0_12, %c0_13] : memref<128x32xf32, #tpu.memory_space<vmem>>, vector<128x32xf32>
    %cst_14 = arith.constant dense<0.000000e+00> : vector<16x32xf32>
    %21 = tpu.matmul %19, %20, %cst_14 {dimension_numbers = #tpu.dot_dimension_numbers<[1], [0], [0], [1], [0, 0, 1, 1], [], []>} : vector<16x128xf32>, vector<128x32xf32>, vector<16x32xf32> -> vector<16x32xf32>
    %c0_15 = arith.constant 0 : index
    %c0_16 = arith.constant 0 : index
    %22 = vector.load %arg8[%c0_15, %c0_16] : memref<1x32xf32, #tpu.memory_space<vmem>>, vector<1x32xf32>
    %23 = vector.broadcast %22 : vector<1x32xf32> to vector<16x32xf32>
    %24 = arith.addf %21, %23 : vector<16x32xf32>
    %c0_17 = arith.constant 0 : index
    %c0_18 = arith.constant 0 : index
    %25 = vector.load %arg9[%c0_17, %c0_18] : memref<16x32xf32, #tpu.memory_space<vmem>>, vector<16x32xf32>
    %26 = arith.addf %24, %25 : vector<16x32xf32>
    %c0_19 = arith.constant 0 : index
    %c0_20 = arith.constant 0 : index
    %27 = vector.load %arg10[%c0_19, %c0_20] : memref<16x32xf32, #tpu.memory_space<vmem>>, vector<16x32xf32>
    tpu.vector_store %arg10[%c0_19, %c0_20], %26 {strides = array<i32>} : memref<16x32xf32, #tpu.memory_space<vmem>>, vector<16x32xf32>,
    return
  }
  func.func @transform_0(%arg0: i32, %arg1: i32) -> (i32, i32) {
    %c0_i32 = arith.constant 0 : i32
    %c0_i32_0 = arith.constant 0 : i32
    return %arg0, %c0_i32 : i32, i32
  }
  func.func @transform_1(%arg0: i32, %arg1: i32) -> (i32, i32) {
    %c0_i32 = arith.constant 0 : i32
    %c0_i32_0 = arith.constant 0 : i32
    return %arg0, %c0_i32 : i32, i32
  }
  func.func @transform_2(%arg0: i32, %arg1: i32) -> (i32, i32) {
    %c0_i32 = arith.constant 0 : i32
    %c0_i32_0 = arith.constant 0 : i32
    return %arg0, %c0_i32 : i32, i32
  }
  func.func @transform_3(%arg0: i32, %arg1: i32) -> (i32, i32) {
    %c0_i32 = arith.constant 0 : i32
    %c0_i32_0 = arith.constant 0 : i32
    return %c0_i32, %arg1 : i32, i32
  }
  func.func @transform_4(%arg0: i32, %arg1: i32) -> (i32, i32) {
    %c0_i32 = arith.constant 0 : i32
    %c0_i32_0 = arith.constant 0 : i32
    return %c0_i32, %arg1 : i32, i32
  }
  func.func @transform_5(%arg0: i32, %arg1: i32) -> (i32, i32) {
    %c0_i32 = arith.constant 0 : i32
    %c0_i32_0 = arith.constant 0 : i32
    return %arg1, %c0_i32 : i32, i32
  }
  func.func @transform_6(%arg0: i32, %arg1: i32) -> (i32, i32) {
    %c0_i32 = arith.constant 0 : i32
    %c0_i32_0 = arith.constant 0 : i32
    %c0_i32_1 = arith.constant 0 : i32
    return %c0_i32, %c0_i32_0 : i32, i32
  }
  func.func @transform_7(%arg0: i32, %arg1: i32) -> (i32, i32) {
    %c0_i32 = arith.constant 0 : i32
    %c0_i32_0 = arith.constant 0 : i32
    return %arg0, %c0_i32 : i32, i32
  }
  func.func @transform_8(%arg0: i32, %arg1: i32) -> (i32, i32) {
    %c0_i32 = arith.constant 0 : i32
    %c0_i32_0 = arith.constant 0 : i32
    return %arg0, %c0_i32 : i32, i32
  }
}

</mosaic_0001>

<bundles_post_ra>
// kernel: gpt_block_forward.6
= control target key start
LH: loop header
LB: loop body
LE: loop exit
PB: predicated region body
PF: predicated region fallthrough
CT: control target
= control target key end

     0   :  { %8 = vsyncpa [#allocation3], 0  ;;  %s246_s0 = inlined_call_operand.hbm [shape: f32[16,32], index: 0, kind: input, shape index: {}]   ;;  %s247_s1 = inlined_call_operand.hbm [shape: f32[16,1], index: 1, kind: output, shape index: {0}]   ;;  %s248_s2 = inlined_call_operand.hbm [shape: f32[16,1], index: 2, kind: output, shape index: {1}]  }
   0x1   :  { %9 = vsyncpa [#allocation4], 0 }
   0x2   :  { %10 = vsyncpa [#allocation7], 0  ;;  %s173_s9 = smov [#allocation2]   ;;  %s101_s13 = scalar_lea.hbm %s246_s0, 256 }
   0x3   :  { %s16_s10 = sshll.u32 %s173_s9, 4  ;;  %p102_p0 = scmp.ne.s32.totalorder %s246_s0, %s101_s13  ;;  %s17_s10 = int_to_ptr.vmem [resolvable:$true] %s16_s10 }
   0x4   :  { %p105_p1 = scmp.lt.u32.totalorder %s101_s13, %s246_s0 }
   0x6   :  { %p107_p2 = pnand %p105_p1, %p102_p0 }
   0x8   :  { %110 = shalt.err (!%p107_p2)
}
   0x9   :  { %s111_s18 = scalar_lea.vmem %s17_s10, 256  ;;  %p116_p4 = scmp.lt.s32.totalorder %s17_s10, %s17_s10 }
   0xa   :  { %p112_p3 = scmp.ne.s32.totalorder %s17_s10, %s111_s18  ;;  %p117_p5 = scmp.lt.s32.totalorder %s111_s18, %s111_s18 }
   0xc   :  { %p118_p6 = por %p117_p5, %p116_p4 }
   0xe   :  { %p119_p7 = pnand %p118_p6, %p112_p3 }
  0x10   :  { %122 = shalt.err (!%p119_p7)
}
  0x11   :  { %s174_s19 = smov 128   ;;  %s175_s20 = smov 8  }
  0x12   :  { %22 = dma.hbm_to_vmem [thread:$0]  %s246_s0, 256, %s17_s10, [#allocation3], %s174_s19, %s174_s19, %s175_s20  }
  0x13   :  { %167 = dma.done.wait [#allocation3], 256  }
  0x14   :  { %168 = vsyncadd [#allocation3], 4294967040  ;;  %vm28_vm0 = vcmask 261120   ;;  %v26_v0 = vld [vmem:[#allocation2] sm:$0xff]  ;;  %v27_v1 = vld [vmem:[#allocation2 + $0x8] sm:$0xff]  ;;  %vm50_vm1 = vcmask 7168  }
  0x15   :  { %v29_v2 = vsel %vm28_vm0, %v26_v0, 0.0  ;;  %v32_v3 = vsel %vm28_vm0, %v27_v1, 0.0  ;;  %s176_s0 = smov [#allocation5]  }
  0x16   :  { %30 = vadd.xlane.f32.xlu0 %v29_v2  ;;  %s64_s23 = sshll.u32 %s176_s0, 4  ;;  %s65_s23 = int_to_ptr.vmem [resolvable:$true] %s64_s23 }
  0x17   :  { %s123_s24 = scalar_lea.vmem %s65_s23, 256  ;;  %p128_p9 = scmp.lt.s32.totalorder %s65_s23, %s65_s23 }
  0x18   :  { %p124_p8 = scmp.ne.s32.totalorder %s65_s23, %s123_s24  ;;  %p129_p10 = scmp.lt.s32.totalorder %s123_s24, %s123_s24 }
  0x1a   :  { %33 = vadd.xlane.f32.xlu0 %v32_v3  ;;  %p130_p11 = por %p129_p10, %p128_p9 }
  0x1c   :  { %p131_p12 = pnand %p130_p11, %p124_p8 }
  0xa3   :  { %v31_v4 = vpop.xlane.xlu0 %30 }
  0xa4   :  { %v36_v5 = vmul.f32 0.03125, %v31_v4 }
  0xa6   :  { %v38_v6 = vsub.f32 %v26_v0, %v36_v5  ;;  %51 = vst.msk [vmem:[#allocation5] sm:$0xff] %vm50_vm1, %v36_v5 }
  0xa7   :  { %v34_v7 = vpop.xlane.xlu0 %33 }
  0xa8   :  { %v37_v8 = vmul.f32 0.03125, %v34_v7  ;;  %v40_v9 = vmul.f32 %v38_v6, %v38_v6 }
  0xaa   :  { %v39_v10 = vsub.f32 %v27_v1, %v37_v8  ;;  %v42_v11 = vsel %vm28_vm0, %v40_v9, 0.0  ;;  %52 = vst.msk [vmem:[#allocation5 + $0x8] sm:$0xff] %vm50_vm1, %v37_v8 }
  0xab   :  { %43 = vadd.xlane.f32.xlu1 %v42_v11 }
  0xac   :  { %v41_v12 = vmul.f32 %v39_v10, %v39_v10 }
  0xae   :  { %v45_v13 = vsel %vm28_vm0, %v41_v12, 0.0 }
  0xaf   :  { %46 = vadd.xlane.f32.xlu1 %v45_v13 }
  0xb0   :  { %134 = shalt.err (!%p131_p12)
}
  0xb1   :  { %s135_s27 = scalar_lea.hbm %s247_s1, 256 }
  0xb2   :  { %p136_p13 = scmp.ne.s32.totalorder %s247_s1, %s135_s27  ;;  %p139_p0 = scmp.lt.u32.totalorder %s135_s27, %s247_s1 }
  0xb4   :  { %p141_p1 = pnand %p139_p0, %p136_p13 }
  0xb6   :  { %144 = shalt.err (!%p141_p1)
}
  0xb7   :  { %70 = dma.vmem_to_hbm [thread:$0]  %s65_s23, 256, %s247_s1, [#allocation4], %s174_s19, %s174_s19, %s175_s20  }
  0xb8   :  { %s177_s6 = smov [#allocation6]  }
  0xb9   :  { %s76_s7 = sshll.u32 %s177_s6, 4  ;;  %s77_s7 = int_to_ptr.vmem [resolvable:$true] %s76_s7 }
  0xba   :  { %s145_s8 = scalar_lea.vmem %s77_s7, 256  ;;  %p150_p3 = scmp.lt.s32.totalorder %s77_s7, %s77_s7 }
  0xbb   :  { %p146_p2 = scmp.ne.s32.totalorder %s77_s7, %s145_s8  ;;  %p151_p4 = scmp.lt.s32.totalorder %s145_s8, %s145_s8 }
  0xbd   :  { %p152_p5 = por %p151_p4, %p150_p3 }
  0xbf   :  { %p153_p6 = pnand %p152_p5, %p146_p2 }
 0x138   :  { %v44_v14 = vpop.xlane.xlu1 %43 }
 0x139   :  { %v48_v15 = vmul.f32 0.03125, %v44_v14 }
 0x13b   :  { %v53_v16 = vadd.f32 1e-05, %v48_v15 }
 0x13c   :  { %v47_v17 = vpop.xlane.xlu1 %46 }
 0x13d   :  { %97 = vrsqrt.f32 %v53_v16  ;;  %v49_v18 = vmul.f32 0.03125, %v47_v17 }
 0x13f   :  { %v54_v19 = vadd.f32 1e-05, %v49_v18 }
 0x141   :  { %99 = vrsqrt.f32 %v54_v19 }
 0x147   :  { %v98_v20 = vpop.eup %97 }
 0x148   :  { %57 = vst.msk [vmem:[#allocation6] sm:$0xff] %vm50_vm1, %v98_v20 }
 0x14b   :  { %v100_v21 = vpop.eup %99 }
 0x14c   :  { %58 = vst.msk [vmem:[#allocation6 + $0x8] sm:$0xff] %vm50_vm1, %v100_v21 }
 0x14d   :  { %156 = shalt.err (!%p153_p6)
}
 0x14e   :  { %s157_s10 = scalar_lea.hbm %s248_s2, 256 }
 0x14f   :  { %p158_p7 = scmp.ne.s32.totalorder %s248_s2, %s157_s10  ;;  %p161_p8 = scmp.lt.u32.totalorder %s157_s10, %s248_s2 }
 0x151   :  { %p163_p9 = pnand %p161_p8, %p158_p7 }
 0x153   :  { %166 = shalt.err (!%p163_p9)
}
 0x154   :  { %82 = dma.vmem_to_hbm [thread:$0]  %s77_s7, 256, %s248_s2, [#allocation7], %s174_s19, %s174_s19, %s175_s20  }
 0x155   :  { %169 = dma.done.wait [#allocation4], 256  }
 0x156   :  { %170 = vsyncadd [#allocation4], 4294967040 }
 0x157   :  { %171 = dma.done.wait [#allocation7], 256  }
 0x158   :  { %172 = vsyncadd [#allocation7], 4294967040 }
 0x159   :  { %89 = vsyncpa [#allocation3], 1 }
 0x15a   :  { %90 = vsyncpa [#allocation4], 1 }
 0x15b   :  { %91 = vsyncpa [#allocation7], 1 }

// kernel: gpt_block_forward.7
= control target key start
LH: loop header
LB: loop body
LE: loop exit
PB: predicated region body
PF: predicated region fallthrough
CT: control target
= control target key end

     0   :  { %10 = vsyncpa [#allocation3], 0  ;;  %s544_s0 = inlined_call_operand.hbm [shape: f32[16,32], index: 0, kind: input, shape index: {}]   ;;  %s545_s1 = inlined_call_operand.hbm [shape: f32[32,96], index: 1, kind: input, shape index: {}]   ;;  %s546_s2 = inlined_call_operand.hbm [shape: f32[1,96], index: 2, kind: input, shape index: {}]   ;;  %s547_s3 = inlined_call_operand.hbm [shape: f32[16,1], index: 3, kind: input, shape index: {}]   ;;  %s548_s4 = inlined_call_operand.hbm [shape: f32[16,1], index: 4, kind: input, shape index: {}]   ;;  %s549_s5 = inlined_call_operand.hbm [shape: f32[16,96], index: 5, kind: output, shape index: {}]  }
   0x1   :  { %11 = vsyncpa [#allocation6], 0 }
   0x2   :  { %12 = vsyncpa [#allocation9], 0 }
   0x3   :  { %13 = vsyncpa [#allocation4], 0  ;;  %s411_s18 = smov [#allocation5]   ;;  %s412_s20 = smov [#allocation8]  }
   0x4   :  { %s31_s19 = sshll.u32 %s411_s18, 4  ;;  %s53_s21 = sshll.u32 %s412_s20, 4  ;;  %s32_s19 = int_to_ptr.vmem [resolvable:$true] %s31_s19  ;;  %s450_s21 = int_to_ptr.vmem [resolvable:$true] %s53_s21 }
   0x5   :  { %s271_s24 = scalar_lea.hbm %s545_s1, 512 }
   0x6   :  { %p272_p0 = scmp.ne.s32.totalorder %s545_s1, %s271_s24  ;;  %p275_p1 = scmp.lt.u32.totalorder %s271_s24, %s545_s1 }
   0x8   :  { %p277_p2 = pnand %p275_p1, %p272_p0 }
   0xa   :  { %280 = shalt.err (!%p277_p2)
}
   0xb   :  { %s281_s29 = scalar_lea.vmem %s32_s19, 512  ;;  %p286_p4 = scmp.lt.s32.totalorder %s32_s19, %s32_s19 }
   0xc   :  { %p282_p3 = scmp.ne.s32.totalorder %s32_s19, %s281_s29  ;;  %p287_p5 = scmp.lt.s32.totalorder %s281_s29, %s281_s29 }
   0xe   :  { %p288_p6 = por %p287_p5, %p286_p4 }
  0x10   :  { %p289_p7 = pnand %p288_p6, %p282_p3 }
  0x12   :  { %292 = shalt.err (!%p289_p7)
}
  0x13   :  { %s413_s30 = smov 128   ;;  %s414_s6 = smov 8  }
  0x14   :  { %37 = dma.hbm_to_vmem [thread:$0]  %s545_s1, 512, %s32_s19, [#allocation6], %s413_s30, %s413_s30, %s414_s6  }
  0x15   :  { %s293_s11 = scalar_lea.hbm %s547_s3, 256 }
  0x16   :  { %p294_p8 = scmp.ne.s32.totalorder %s547_s3, %s293_s11  ;;  %p297_p9 = scmp.lt.u32.totalorder %s293_s11, %s547_s3 }
  0x18   :  { %p299_p10 = pnand %p297_p9, %p294_p8 }
  0x1a   :  { %302 = shalt.err (!%p299_p10)
}
  0x1b   :  { %s303_s16 = scalar_lea.vmem %s450_s21, 256  ;;  %p308_p12 = scmp.lt.s32.totalorder %s450_s21, %s450_s21 }
  0x1c   :  { %p304_p11 = scmp.ne.s32.totalorder %s450_s21, %s303_s16  ;;  %p309_p13 = scmp.lt.s32.totalorder %s303_s16, %s303_s16 }
  0x1e   :  { %p310_p0 = por %p309_p13, %p308_p12 }
  0x20   :  { %p311_p1 = pnand %p310_p0, %p304_p11 }
  0x22   :  { %314 = shalt.err (!%p311_p1)
}
  0x23   :  { %59 = dma.hbm_to_vmem [thread:$0]  %s547_s3, 256, %s450_s21, [#allocation9], %s413_s30, %s413_s30, %s414_s6  }
  0x24   :  { %s415_s18 = smov [#allocation2]   ;;  %s416_s20 = smov [#allocation7]  }
  0x25   :  { %s19_s19 = sshll.u32 %s415_s18, 4  ;;  %s44_s22 = sshll.u32 %s416_s20, 4  ;;  %s20_s19 = int_to_ptr.vmem [resolvable:$true] %s19_s19  ;;  %s45_s22 = int_to_ptr.vmem [resolvable:$true] %s44_s22 }
  0x26   :  { %s315_s25 = scalar_lea.hbm %s544_s0, 256 }
  0x27   :  { %p316_p2 = scmp.ne.s32.totalorder %s544_s0, %s315_s25  ;;  %p319_p3 = scmp.lt.u32.totalorder %s315_s25, %s544_s0 }
  0x29   :  { %p321_p4 = pnand %p319_p3, %p316_p2 }
  0x2b   :  { %324 = shalt.err (!%p321_p4)
}
  0x2c   :  { %s325_s3 = scalar_lea.vmem %s20_s19, 256  ;;  %p330_p6 = scmp.lt.s32.totalorder %s20_s19, %s20_s19 }
  0x2d   :  { %p326_p5 = scmp.ne.s32.totalorder %s20_s19, %s325_s3  ;;  %p331_p7 = scmp.lt.s32.totalorder %s325_s3, %s325_s3 }
  0x2f   :  { %p332_p8 = por %p331_p7, %p330_p6 }
  0x31   :  { %p333_p9 = pnand %p332_p8, %p326_p5 }
  0x33   :  { %336 = shalt.err (!%p333_p9)
}
  0x34   :  { %25 = dma.hbm_to_vmem [thread:$0]  %s544_s0, 256, %s20_s19, [#allocation3], %s413_s30, %s413_s30, %s414_s6  }
  0x35   :  { %s337_s10 = scalar_lea.hbm %s546_s2, 16 }
  0x36   :  { %p338_p10 = scmp.ne.s32.totalorder %s546_s2, %s337_s10  ;;  %p341_p11 = scmp.lt.u32.totalorder %s337_s10, %s546_s2 }
  0x38   :  { %p343_p12 = pnand %p341_p11, %p338_p10 }
  0x3a   :  { %346 = shalt.err (!%p343_p12)
}
  0x3b   :  { %s347_s15 = scalar_lea.vmem %s45_s22, 16  ;;  %s351_s16 = scalar_lea.vmem %s45_s22, 32 }
  0x3c   :  { %p348_p13 = scmp.ne.s32.totalorder %s45_s22, %s347_s15  ;;  %p352_p0 = scmp.lt.s32.totalorder %s45_s22, %s45_s22 }
  0x3d   :  { %p353_p1 = scmp.lt.s32.totalorder %s351_s16, %s347_s15 }
  0x3f   :  { %p354_p2 = por %p353_p1, %p352_p0 }
  0x41   :  { %p355_p3 = pnand %p354_p2, %p348_p13 }
  0x43   :  { %358 = shalt.err (!%p355_p3)
}
  0x44   :  { %47 = dma.hbm_to_vmem [thread:$0]  %s546_s2, 16, %s45_s22, [#allocation6]  }
  0x45   :  { %s417_s17 = smov [#allocation10]   ;;  %s359_s23 = scalar_lea.hbm %s548_s4, 256 }
  0x46   :  { %s65_s18 = sshll.u32 %s417_s17, 4  ;;  %p360_p4 = scmp.ne.s32.totalorder %s548_s4, %s359_s23  ;;  %s66_s18 = int_to_ptr.vmem [resolvable:$true] %s65_s18 }
  0x47   :  { %p363_p5 = scmp.lt.u32.totalorder %s359_s23, %s548_s4 }
  0x49   :  { %p365_p6 = pnand %p363_p5, %p360_p4 }
  0x4b   :  { %368 = shalt.err (!%p365_p6)
}
  0x4c   :  { %s369_s28 = scalar_lea.vmem %s66_s18, 256  ;;  %p374_p8 = scmp.lt.s32.totalorder %s66_s18, %s66_s18 }
  0x4d   :  { %p370_p7 = scmp.ne.s32.totalorder %s66_s18, %s369_s28  ;;  %p375_p9 = scmp.lt.s32.totalorder %s369_s28, %s369_s28 }
  0x4f   :  { %p376_p10 = por %p375_p9, %p374_p8 }
  0x51   :  { %p377_p11 = pnand %p376_p10, %p370_p7 }
  0x53   :  { %380 = shalt.err (!%p377_p11)
}
  0x54   :  { %71 = dma.hbm_to_vmem [thread:$0]  %s548_s4, 256, %s66_s18, [#allocation9], %s413_s30, %s413_s30, %s414_s6  }
  0x55   :  { %403 = dma.done.wait [#allocation3], 256  }
  0x56   :  { %404 = vsyncadd [#allocation3], 4294967040 }
  0x57   :  { %405 = dma.done.wait [#allocation6], 528  }
  0x58   :  { %406 = vsyncadd [#allocation6], 4294966768 }
  0x59   :  { %407 = dma.done.wait [#allocation9], 512  }
  0x5a   :  { %408 = vsyncadd [#allocation9], 4294966784  ;;  %v418_v0 = vmov 0   ;;  %v103_v1 = vld [vmem:[#allocation10] sm:$0xff]  ;;  %v89_v2 = vld [vmem:[#allocation8] sm:$0xff]  ;;  %vm128_vm0 = vcmask 261120  }
  0x5b   :  { %270 = vset.pattern.permute.xlu1 %v418_v0  ;;  %269 = vset.pattern.permute.xlu0 %v418_v0  ;;  %v104_v3 = vld [vmem:[#allocation10 + $0x8] sm:$0xff]  ;;  %v90_v4 = vld [vmem:[#allocation8 + $0x8] sm:$0xff]  ;;  %s419_s4 = smov [#allocation11]   ;;  %vm210_vm1 = vcmask 785408  }
  0x5c   :  { %107 = vperm.xlu1 %270, %v103_v1   ;;  %93 = vperm.xlu0 %269, %v89_v2   ;;  %v117_v5 = vld [vmem:[#allocation5] sm:$0xff]  ;;  %v118_v6 = vld [vmem:[#allocation5 + $0x8] sm:$0xff]  ;;  %v119_v7 = vld [vmem:[#allocation5 + $0x10] sm:$0xff]  ;;  %s218_s29 = sshll.u32 %s419_s4, 4  ;;  %s219_s29 = int_to_ptr.vmem [resolvable:$true] %s218_s29 }
  0x5d   :  { %v120_v8 = vld [vmem:[#allocation5 + $0x18] sm:$0xff]  ;;  %v252_v9 = vpack.c.bf16 %v118_v6, %v117_v5  ;;  %v87_v11 = vld [vmem:[#allocation2] sm:$0xff]  ;;  %v232_v21 = vld [vmem:[#allocation7] ss:$0 sm:$0xff]  ;;  %s381_s3 = scalar_lea.vmem %s219_s29, 256  ;;  %p386_p13 = scmp.lt.s32.totalorder %s219_s29, %s219_s29 }
  0x5e   :  { %v256_v10 = vpack.c.bf16 %v120_v8, %v119_v7  ;;  %v88_v15 = vld [vmem:[#allocation2 + $0x8] sm:$0xff]  ;;  %p382_p12 = scmp.ne.s32.totalorder %s219_s29, %s381_s3  ;;  %p387_p0 = scmp.lt.s32.totalorder %s381_s3, %s381_s3 }
  0x5f   :  { %253 = vmatprep.subr.bf16.mxu0 %v252_v9 }
  0x60   :  { %112 = vperm.xlu1 %270, %v104_v3   ;;  %98 = vperm.xlu0 %269, %v90_v4   ;;  %p388_p1 = por %p387_p0, %p386_p13 }
  0x61   :  { %255 = vmatpush3.bf16.msra.mxu0 %v252_v9 }
  0x62   :  { %257 = vmatprep.subr.bf16.mxu0 %v256_v10  ;;  %p389_p2 = pnand %p388_p1, %p382_p12 }
  0x65   :  { %259 = vmatpush3.bf16.msra.mxu0 %v256_v10 }
  0xdb   :  { %v108_v12 = vpop.permute.xlu1 %107  ;;  %v94_v13 = vpop.permute.xlu0 %93 }
  0xdc   :  { %v101_v14 = vsub.f32 %v87_v11, %v94_v13 }
  0xde   :  { %v115_v16 = vmul.f32 %v108_v12, %v101_v14 }
  0xdf   :  { %v99_v17 = vpop.permute.xlu0 %98  ;;  %v113_v19 = vpop.permute.xlu1 %112 }
  0xe0   :  { %v102_v18 = vsub.f32 %v88_v15, %v99_v17  ;;  %249 = vmatprep.mubr.msk.f32.mxu0 %vm128_vm0, %v115_v16 }
  0xe2   :  { %v116_v20 = vmul.f32 %v113_v19, %v102_v18 }
  0xe4   :  { %250 = vmatmul.mubr.msk.f32.vlgmr.msra.gmra.mrb[0].mxu0 %vm128_vm0, %v116_v20 }
 0x1b7   :  { %v251_v22 = vpop.f32.mrb[0].mxu0 }
 0x1b8   :  { %v207_v23 = vadd.f32 %v251_v22, %v232_v21  ;;  %v201_v24 = vpop.f32.mrb[1].mxu0 }
 0x1b9   :  { %v202_v25 = vadd.f32 %v232_v21, %v201_v24 }
 0x1ba   :  { %212 = vst.msk [vmem:[#allocation11 + $0x8] sm:$0xff] %vm210_vm1, %v207_v23 }
 0x1bb   :  { %211 = vst.msk [vmem:[#allocation11] sm:$0xff] %vm210_vm1, %v202_v25 }
 0x1bc   :  { %392 = shalt.err (!%p389_p2)
}
 0x1bd   :  { %s393_s8 = scalar_lea.hbm %s549_s5, 256 }
 0x1be   :  { %p394_p3 = scmp.ne.s32.totalorder %s549_s5, %s393_s8  ;;  %p397_p4 = scmp.lt.u32.totalorder %s393_s8, %s549_s5 }
 0x1c0   :  { %p399_p5 = pnand %p397_p4, %p394_p3 }
 0x1c2   :  { %402 = shalt.err (!%p399_p5)
}
 0x1c3   :  { %224 = dma.vmem_to_hbm [thread:$0]  %s219_s29, 256, %s549_s5, [#allocation4], %s413_s30, %s413_s30, %s414_s6  }
 0x1c4   :  { %409 = dma.done.wait [#allocation4], 256  }
 0x1c5   :  { %410 = vsyncadd [#allocation4], 4294967040 }
 0x1c6   :  { %228 = vsyncpa [#allocation3], 1 }
 0x1c7   :  { %229 = vsyncpa [#allocation6], 1 }
 0x1c8   :  { %230 = vsyncpa [#allocation9], 1 }
 0x1c9   :  { %231 = vsyncpa [#allocation4], 1 }

// kernel: gpt_block_forward.8
= control target key start
LH: loop header
LB: loop body
LE: loop exit
PB: predicated region body
PF: predicated region fallthrough
CT: control target
= control target key end

     0   :  { %s1270_s0 = inlined_call_operand.hbm [shape: f32[8,8,8], index: 0, kind: input, shape index: {}]   ;;  %s1271_s1 = inlined_call_operand.hbm [shape: f32[8,8,8], index: 1, kind: input, shape index: {}]   ;;  %s1272_s2 = inlined_call_operand.hbm [shape: f32[8,8,8], index: 2, kind: input, shape index: {}]   ;;  %s1273_s3 = inlined_call_operand.hbm [shape: f32[8,8,8], index: 3, kind: output, shape index: {}]  }
   0x1   :  { %1279 = sst [smem:[#allocation18_spill]] %s1271_s1 }
   0x2   :  { %8 = vsyncpa [#allocation6], 0 }
   0x3   :  { %10 = vsyncpa [#allocation6 + $0x1], 0 }
   0x4   :  { %11 = vsyncpa [#allocation9], 0 }
   0x5   :  { %13 = vsyncpa [#allocation9 + $0x1], 0 }
   0x6   :  { %14 = vsyncpa [#allocation7], 0 }
   0x7   :  { %16 = vsyncpa [#allocation7 + $0x1], 0  ;;  %s996_s12 = smov 0   ;;  %s998_s13 = smov 0  }
   0x8   :  { %s1000_s14 = smov 0   ;;  %s1002_s15 = smov 0  }
   0x9   :  { %s1004_s16 = smov 0   ;;  %s1006_s17 = smov 0  }
   0xa LB: > { %1280 = sst [smem:[#allocation15_spill]] %s962_s16  ;;  %s1027_s18 = sadd.s32 4294967295, %s966_s17   ;;  %s966_s17 = sphi %s1006_s17, %s22_s17   ;;  %s962_s16 = sphi %s1004_s16, %s1300_s16   ;;  %s958_s15 = sphi %s1002_s15, %s1299_s15   ;;  %s954_s14 = sphi %s1000_s14, %s1303_s14   ;;  %s950_s13 = sphi %s998_s13, %s1302_s13   ;;  %s946_s12 = sphi %s996_s12, %s1301_s12  }
   0xb   : > { %s670_s19 = sadd.s32 4294967294, %s966_s17   ;;  %s41_s20 = sadd.s32 1, %s962_s16 }
   0xc   : > { %s50_s21 = sadd.s32 1, %s954_s14  ;;  %p43_p0 = scmp.ge.s32.totalorder %s41_s20, 8 }
   0xd   : > { %p57_p1 = scmp.ne.s32.totalorder %s954_s14, %s950_s13  ;;  %p58_p2 = scmp.eq.s32.totalorder %s966_s17, 0 }
   0xe   : > { %p63_p3 = scmp.ne.s32.totalorder %s950_s13, %s946_s12  ;;  %s1305_s20 = smov (%p43_p0, %s41_s20), 0 }
   0xf   : > { %1281 = sst [smem:[#allocation16_spill]] %s1305_s20  ;;  %p1039_p4 = por %p58_p2, %p57_p1 }
  0x10   : > { %p64_p5 = scmp.eq.s32.totalorder %s1027_s18, 0  ;;  %s45_s23 = ssub.s32 %s962_s16, %s1305_s20 }
  0x11   : > { %p141_p6 = scmp.eq.s32.totalorder %s1027_s18, 7  ;;  %p48_p7 = scmp.eq.s32.totalorder %s45_s23, 0 }
  0x12   : > { %p1047_p8 = por %p64_p5, %p63_p3  ;;  %p147_p10 = scmp.eq.s32.totalorder %s670_s19, 7 }
  0x13   : > { %p1051_p9 = por %p141_p6, %p57_p1  ;;  %p728_p12 = scmp.lt.s32.totalorder %s966_s17, 8 }
  0x14   : > { %s1283_s24 = scalar_select %p1047_p8, 1, 0 }
  0x15   : > { %s1284_s25 = scalar_select %p1051_p9, 1, 0 }
  0x16   : > { %s1056_s26 = scalar_select %p48_p7, %s954_s14, %s50_s21  }
  0x17   : > { %p1058_p11 = por %p147_p10, %p63_p3  ;;  %s167_s28 = sand.u32 1, %s954_s14  }
  0x18   : > { %1285 = sst [smem:[#allocation17_spill]] %s1056_s26  ;;  %s1066_s29 = sshll.u32 %s167_s28, 3 }
  0x19   : > { %s1286_s27 = scalar_select %p1058_p11, 1, 0 }
  0x1a   : > { %s1069_s30 = sshll.u32 %s962_s16, 7  ;;  %p1073_p13 = pnand %p728_p12, %p1039_p4 }
  0x1b   : > { %s186_s5 = sand.u32 1, %s966_s17   ;;  %s1288_s1 = sld [smem:[#allocation18_spill]] }
  0x1c   : > { %s1287_s4 = scalar_select %p1073_p13, 1, 0 }
  0x1d   : > { %s190_s9 = scalar_lea.vmem [#allocation8], %s1066_s29  ;;  %s1089_s11 = scalar_lea.sflag [#allocation9], %s186_s5 }
  0x1e   : > { %s197_s10 = sshll.u32 %s190_s9, 4  ;;  %p1095_p3 = pneg %p1073_p13  ;;  %s1086_s10 = int_to_ptr.vmem [resolvable:$true] %s197_s10 }
  0x21   : > { %s1082_s8 = scalar_lea.hbm %s1288_s1, %s1069_s30  ;;  %s795_s6 = scalar_lea.hbm %s1288_s1, 1024 }
  0x22   : > { %s790_s19 = scalar_lea.hbm %s1082_s8, 128  ;;  %p796_p6 = scmp.lt.u32.totalorder %s1082_s8, %s1288_s1 }
  0x23   : > { %p791_p2 = scmp.ne.s32.totalorder %s1082_s8, %s790_s19  ;;  %p797_p7 = scmp.lt.u32.totalorder %s795_s6, %s790_s19 }
  0x24   : > { %p799_p12 = scmp.lt.u32.totalorder %s790_s19, %s1082_s8 }
  0x25   : > { %p793_p4 = pnand %p1095_p3, %p791_p2  ;;  %p798_p10 = por %p797_p7, %p796_p6 }
  0x27   : > { %p794_p5 = pneg %p793_p4  ;;  %p800_p0 = por %p799_p12, %p798_p10 }
  0x29   : > { %p801_p1 = pnand %p800_p0, %p794_p5 }
  0x2b   : > { %804 = shalt.err (!%p801_p1)
}
  0x2c   : > { %s805_s5 = scalar_lea.vmem %s1086_s10, 128  ;;  %s968_s22 = smov [#allocation8]  }
  0x2d   : > { %p806_p2 = scmp.ne.s32.totalorder %s1086_s10, %s805_s5  ;;  %s810_s23 = sshll.u32 %s968_s22, 4  ;;  %s811_s23 = int_to_ptr.vmem [resolvable:$false] %s810_s23 }
  0x2e   : > { %s812_s7 = scalar_lea.vmem %s811_s23, 256  ;;  %p813_p9 = scmp.lt.s32.totalorder %s1086_s10, %s811_s23 }
  0x2f   : > { %p808_p4 = pnand %p806_p2, %p1095_p3  ;;  %p814_p8 = scmp.lt.s32.totalorder %s812_s7, %s805_s5 }
  0x31   : > { %p809_p11 = pneg %p808_p4  ;;  %p815_p6 = por %p814_p8, %p813_p9 }
  0x33   : > { %p816_p7 = pnand %p815_p6, %p809_p11 }
  0x35   : > { %819 = shalt.err (!%p816_p7)
}
  0x36   : > { %720 = dma.hbm_to_vmem [thread:$0]  (!%p1073_p13), %s1082_s8, 128, %s1086_s10, %s1089_s11  }
  0x37   : > { %p1290_p0 = scmp.lt.s32.totalorder %s966_s17, 9  ;;  %p1291_p1 = scmp.ge.s32.totalorder %s966_s17, 1 }
  0x38   : > { %s1131_s5 = scalar_lea.hbm %s1270_s0, %s1069_s30  ;;  %s171_s22 = scalar_lea.vmem [#allocation5], %s1066_s29 }
  0x39   : > { %p1123_p5 = pnand %p1291_p1, %p1290_p0  ;;  %s179_s23 = sshll.u32 %s171_s22, 4  ;;  %s1134_s23 = int_to_ptr.vmem [resolvable:$true] %s179_s23 }
  0x3a   : > { %s1140_s7 = scalar_lea.hbm %s1272_s2, %s1069_s30  ;;  %s168_s1 = scalar_lea.sflag [#allocation6], %s167_s28 }
  0x3b   : > { %s1292_s19 = scalar_select %p1123_p5, 1, 0 }
  0x3c   : > { %s820_s20 = scalar_lea.hbm %s1131_s5, 128  ;;  %s825_s16 = scalar_lea.hbm %s1270_s0, 1024 }
  0x3d   : > { %p821_p8 = scmp.ne.s32.totalorder %s1131_s5, %s820_s20  ;;  %p826_p10 = scmp.lt.u32.totalorder %s1131_s5, %s1270_s0 }
  0x3e   : > { %p827_p12 = scmp.lt.u32.totalorder %s825_s16, %s820_s20  ;;  %p829_p4 = scmp.lt.u32.totalorder %s820_s20, %s1131_s5 }
  0x3f   : > { %p823_p9 = pnand %p821_p8, %p1095_p3 }
  0x40   : > { %p828_p2 = por %p827_p12, %p826_p10 }
  0x41   : > { %p824_p11 = pneg %p823_p9 }
  0x42   : > { %p830_p6 = por %p829_p4, %p828_p2 }
  0x44   : > { %p831_p7 = pnand %p830_p6, %p824_p11 }
  0x46   : > { %834 = shalt.err (!%p831_p7)
}
  0x47   : > { %s835_s28 = scalar_lea.vmem %s1134_s23, 128  ;;  %s969_s30 = smov [#allocation5]  }
  0x48   : > { %p836_p0 = scmp.ne.s32.totalorder %s1134_s23, %s835_s28  ;;  %s840_s8 = sshll.u32 %s969_s30, 4  ;;  %s841_s8 = int_to_ptr.vmem [resolvable:$false] %s840_s8 }
  0x49   : > { %s842_s26 = scalar_lea.vmem %s841_s8, 256  ;;  %p843_p9 = scmp.lt.s32.totalorder %s1134_s23, %s841_s8 }
  0x4a   : > { %p838_p1 = pnand %p836_p0, %p1095_p3  ;;  %p844_p5 = scmp.lt.s32.totalorder %s842_s26, %s835_s28 }
  0x4c   : > { %p839_p8 = pneg %p838_p1  ;;  %p845_p10 = por %p844_p5, %p843_p9 }
  0x4e   : > { %p846_p12 = pnand %p845_p10, %p839_p8 }
  0x50   : > { %849 = shalt.err (!%p846_p12)
}
  0x51   : > { %717 = dma.hbm_to_vmem [thread:$0]  (!%p1073_p13), %s1131_s5, 128, %s1134_s23, %s168_s1  }
  0x52   : > { %s208_s16 = scalar_lea.vmem [#allocation10], %s1066_s29  ;;  %s850_s10 = scalar_lea.hbm %s1140_s7, 128 }
  0x53   : > { %s215_s20 = sshll.u32 %s208_s16, 4  ;;  %p851_p11 = scmp.ne.s32.totalorder %s1140_s7, %s850_s10  ;;  %s216_s20 = int_to_ptr.vmem [resolvable:$true] %s215_s20 }
  0x54   : > { %s855_s22 = scalar_lea.hbm %s1272_s2, 1024  ;;  %p856_p4 = scmp.lt.u32.totalorder %s1140_s7, %s1272_s2 }
  0x55   : > { %p853_p5 = pnand %p851_p11, %p1095_p3  ;;  %p857_p6 = scmp.lt.u32.totalorder %s855_s22, %s850_s10 }
  0x56   : > { %p859_p0 = scmp.lt.u32.totalorder %s850_s10, %s1140_s7 }
  0x57   : > { %p854_p2 = pneg %p853_p5  ;;  %p858_p7 = por %p857_p6, %p856_p4 }
  0x59   : > { %p860_p1 = por %p859_p0, %p858_p7 }
  0x5b   : > { %p861_p8 = pnand %p860_p1, %p854_p2 }
  0x5d   : > { %864 = shalt.err (!%p861_p8)
}
  0x5e   : > { %s865_s1 = scalar_lea.vmem %s216_s20, 128  ;;  %s970_s29 = smov [#allocation10]  }
  0x5f   : > { %p866_p9 = scmp.ne.s32.totalorder %s216_s20, %s865_s1  ;;  %s870_s5 = sshll.u32 %s970_s29, 4  ;;  %s871_s5 = int_to_ptr.vmem [resolvable:$false] %s870_s5 }
  0x60   : > { %s872_s23 = scalar_lea.vmem %s871_s5, 256  ;;  %p873_p11 = scmp.lt.s32.totalorder %s216_s20, %s871_s5 }
  0x61   : > { %p868_p10 = pnand %p866_p9, %p1095_p3  ;;  %p874_p5 = scmp.lt.s32.totalorder %s872_s23, %s865_s1 }
  0x63   : > { %p869_p12 = pneg %p868_p10  ;;  %p875_p13 = por %p874_p5, %p873_p11 }
  0x65   : > { %p876_p4 = pnand %p875_p13, %p869_p12 }
  0x67   : > { %879 = shalt.err (!%p876_p4)
}
  0x68   : > { %p1293_p6 = scmp.ne.s32.totalorder %s1287_s4, 0  ;;  %p1294_p2 = scmp.ne.s32.totalorder %s1292_s19, 0 }
  0x69   : > { %s1187_s21 = sand.u32 (!%p1294_p2), 1, %s950_s13   ;;  %p1295_p13 = scmp.ne.s32.totalorder (!%p1294_p2), %s1283_s24, 0 }
  0x6a   : > { %723 = dma.hbm_to_vmem [thread:$0]  (!%p1293_p6), %s1140_s7, 128, %s216_s20, %s1089_s11  }
  0x6b   : > { %224 = sbr.rel (%p1294_p2) target bundleno = 936 (0x3a8), region = 32  ;;  %s1190_s8 = sshll.u32 (!%p1294_p2), %s1187_s21, 3 }
  0x6c   : > { %s227_s26 = scalar_lea.sflag (!%p1294_p2), [#allocation6], %s1187_s21  ;;  %s230_s16 = scalar_lea.vmem (!%p1294_p2), [#allocation5], %s1190_s8 }
  0x72   : > { %933 = dma.done.wait (%p1295_p13), %s227_s26, 128  }
  0x73   : > { %935 = vsyncadd (%p1295_p13), %s227_s26, 4294967168  ;;  %s235_s4 = sand.u32 1, %s1027_s18   ;;  %s239_s19 = scalar_lea.vmem [#allocation8], %s1190_s8 }
  0x74   : > { %s236_s11 = scalar_lea.sflag [#allocation9], %s235_s4 }
  0x75   : > { %937 = dma.done.wait (%p1295_p13), %s236_s11, 256  }
  0x76   : > { %939 = vsyncadd (%p1295_p13), %s236_s11, 4294967040  ;;  %vm288_vm0 = vcmask 64512   ;;  %v971_v0 = vmov 0.0   ;;  %vm972_vm1 = vmmov 0   ;;  %v292_v1 = vld [vmem:[%s239_s19] sm:$0xff]  ;;  %v295_v2 = vld [vmem:[%s230_s16] sm:$0xff]  ;;  %v385_v4 = vlaneseq }
  0x77   : > { %696 = vmatprep.subr.mxu0 %v971_v0  ;;  %289 = vst.msk [vmem:[#allocation4] sm:$0xff] %vm288_vm0, %v971_v0  ;;  %698 = vmatprep.mubr.msk.f32.mxu0 %vm972_vm1, %v971_v0  ;;  %vm285_vm2 = vcmask 7168   ;;  %v973_v3 = vmov -inf   ;;  %v974_v13 = vmov 0   ;;  %s248_s18 = scalar_lea.vmem [#allocation10], %s1190_s8  ;;  %s689_s24 = sshll.u32 %s958_s15, 7 }
  0x78   : > { %701 = vmatprep.subr.mxu1 %v971_v0  ;;  %703 = vmatprep.mubr.msk.f32.mxu1 %vm972_vm1, %v971_v0  ;;  %286 = vst.msk [vmem:[#allocation2] sm:$0xff] %vm285_vm2, %v973_v3  ;;  %287 = vst.msk [vmem:[#allocation3] sm:$0xff] %vm285_vm2, %v971_v0  ;;  %v386_v5 = vshrl.u32 %v385_v4, 7  ;;  %v390_v6 = vand.u32 127, %v385_v4  ;;  %v294_v18 = vld [vmem:[%s248_s18] sm:$0xff]  ;;  %s280_s7 = scalar_lea.vmem [#allocation11], %s1190_s8  ;;  %s1221_s9 = scalar_lea.hbm %s1273_s3, %s689_s24 }
  0x79   : > { %697 = vmatpush3.xpose.msk.msra.mxu0 %vm288_vm0, %v292_v1  ;;  %782 = vset.pattern.permute.xlu0 %v974_v13  ;;  %s539_s20 = sshll.u32 %s280_s7, 4  ;;  %s525_s22 = scalar_lea.sflag [#allocation7], %s1187_s21  ;;  %s1223_s20 = int_to_ptr.vmem [resolvable:$true] %s539_s20 }
  0x7a   : > { %vm393_vm3 = vcmp.le.s32.totalorder %v390_v6, %v386_v5  ;;  %783 = vset.pattern.permute.xlu1 %v974_v13  ;;  %702 = vmatpush3.msra.mxu1 %v294_v18  ;;  %s880_s28 = scalar_lea.vmem %s1223_s20, 128  ;;  %p1296_p7 = scmp.ne.s32.totalorder %s1284_s25, 0 }
  0x7b   : > { %v686_v8 = vsel %vm393_vm3, 1.0, %v971_v0  ;;  %p881_p3 = scmp.ne.s32.totalorder %s1223_s20, %s880_s28  ;;  %s975_s15 = smov [#allocation11]  }
  0x7c   : > { %699 = vmatmul.mubr.msk.f32.vlgmr.msra.gmra.mrb[0].mxu0 %vm288_vm0, %v295_v2  ;;  %s884_s30 = sshll.u32 %s975_s15, 4  ;;  %s885_s30 = int_to_ptr.vmem [resolvable:$false] %s884_s30 }
  0x7d   : > { %p882_p0 = pnand %p881_p3, %p1296_p7  ;;  %s886_s1 = scalar_lea.vmem %s885_s30, 256 }
  0x7e   : > { %v428_v32 = vld [vmem:[#allocation4] sm:$0xff]  ;;  %p887_p8 = scmp.lt.s32.totalorder %s1223_s20, %s885_s30  ;;  %p888_p9 = scmp.lt.s32.totalorder %s886_s1, %s880_s28 }
  0x7f   : > { %v404_v14 = vld [vmem:[#allocation2] sm:$0xff]  ;;  %v420_v26 = vld [vmem:[#allocation3] sm:$0xff]  ;;  %p883_p1 = pneg %p882_p0 }
  0x80   : > { %p889_p10 = por %p888_p9, %p887_p8 }
  0x82   : > { %p890_p12 = pnand %p889_p10, %p883_p1 }
 0x14f   : > { %v369_v7 = vpop.f32.mrb[0].mxu0 }
 0x150   : > { %v373_v9 = vmul.f32 0.35355338, %v369_v7  ;;  %v700_v10 = vpop.f32.mrb[1].mxu0 }
 0x152   : > { %v396_v11 = vadd.f32 %v686_v8, %v373_v9 }
 0x154   : > { %v405_v12 = vsel %vm288_vm0, %v396_v11, -inf }
 0x155   : > { %406 = vmax.xlane.f32.xlu0 %v405_v12 }
 0x1e2   : > { %v407_v15 = vpop.xlane.xlu0 %406 }
 0x1e3   : > { %v408_v16 = vmax.f32 %v404_v14, %v407_v15 }
 0x1e5   : > { %v409_v17 = vsub.f32 %v404_v14, %v408_v16  ;;  %510 = vst.msk [vmem:[#allocation2] sm:$0xff] %vm285_vm2, %v408_v16  ;;  %414 = vperm.xlu0 %782, %v408_v16  }
 0x1e7   : > { %v410_v24 = vmul.f32 1.442695, %v409_v17 }
 0x264   : > { %v415_v19 = vpop.permute.xlu0 %414 }
 0x265   : > { %v417_v20 = vsub.f32 %v396_v11, %v415_v19 }
 0x267   : > { %v418_v21 = vmul.f32 1.442695, %v417_v20 }
 0x269   : > { %784 = vpow2.f32 %v418_v21 }
 0x26a   : > { %786 = vpow2.f32 %v410_v24 }
 0x273   : > { %v785_v22 = vpop.eup %784 }
 0x274   : > { %704 = vmatmul.mubr.msk.f32.vlgmr.msra.gmra.mrb[0].mxu1 %vm288_vm0, %v785_v22  ;;  %v422_v23 = vsel %vm288_vm0, %v785_v22, 0.0  ;;  %v787_v25 = vpop.eup %786 }
 0x275   : > { %423 = vadd.xlane.f32.xlu1 %v422_v23  ;;  %v421_v27 = vmul.f32 %v787_v25, %v420_v26 }
 0x286   : > { %431 = vperm.xlu1 %783, %v787_v25  }
 0x302   : > { %v424_v28 = vpop.xlane.xlu1 %423 }
 0x303   : > { %v425_v29 = vadd.f32 %v424_v28, %v421_v27 }
 0x305   : > { %427 = vst.msk [vmem:[#allocation3] sm:$0xff] %vm285_vm2, %v425_v29 }
 0x306   : > { %v432_v33 = vpop.permute.xlu1 %431 }
 0x307   : > { %v434_v34 = vmul.f32 %v432_v33, %v428_v32 }
 0x30c   : > { %v515_v30 = vld [vmem:[#allocation3] sm:$0xff] }
 0x30d   : > { %788 = vrcp.f32 %v515_v30 }
 0x317   : > { %v789_v31 = vpop.eup %788 }
 0x318   : > { %519 = vperm.xlu1 %783, %v789_v31  }
 0x347   : > { %v504_v35 = vpop.f32.mrb[0].mxu1 }
 0x348   : > { %v508_v36 = vadd.f32 %v504_v35, %v434_v34  ;;  %v705_v37 = vpop.f32.mrb[1].mxu1 }
 0x34a   : > { %509 = vst.msk [vmem:[#allocation4] sm:$0xff] %vm288_vm0, %v508_v36 }
 0x351   : > { %v514_v38 = vld [vmem:[#allocation4] sm:$0xff] }
 0x397   : > { %v520_v39 = vpop.permute.xlu1 %519 }
 0x398   : > { %v522_v40 = vmul.f32 %v520_v39, %v514_v38 }
 0x39a   : > { %523 = vst.msk [vmem:[%s280_s7] sm:$0xff] %vm288_vm0, %v522_v40 }
 0x39b   : > { %893 = shalt.err (!%p890_p12)
}
 0x39c   : > { %s894_s29 = scalar_lea.hbm %s1221_s9, 128  ;;  %s898_s21 = scalar_lea.hbm %s1273_s3, 1024 }
 0x39d   : > { %p895_p11 = scmp.ne.s32.totalorder %s1221_s9, %s894_s29  ;;  %p899_p6 = scmp.lt.u32.totalorder %s1221_s9, %s1273_s3 }
 0x39e   : > { %p900_p2 = scmp.lt.u32.totalorder %s898_s21, %s894_s29  ;;  %p902_p3 = scmp.lt.u32.totalorder %s894_s29, %s1221_s9 }
 0x39f   : > { %p896_p5 = pnand %p895_p11, %p1296_p7 }
 0x3a0   : > { %p901_p13 = por %p900_p2, %p899_p6 }
 0x3a1   : > { %p897_p4 = pneg %p896_p5 }
 0x3a2   : > { %p903_p0 = por %p902_p3, %p901_p13 }
 0x3a4   : > { %p904_p1 = pnand %p903_p0, %p897_p4 }
 0x3a6   : > { %907 = shalt.err (!%p904_p1)
}
 0x3a7   : > { %712 = dma.vmem_to_hbm [thread:$0]  (%p1296_p7), %s1223_s20, 128, %s1221_s9, %s525_s22  }
 0x3a8 PF: > { %p729_p8 = scmp.ge.s32.totalorder %s966_s17, 2  ;;  %s551_s16 = sand.u32 1, %s946_s12  }
 0x3a9   : > { %p1297_p9 = scmp.ne.s32.totalorder %s1286_s27, 0  ;;  %s552_s4 = scalar_lea.sflag [#allocation7], %s551_s16 }
 0x3ab   : > { %p725_p10 = pnand %p729_p8, %p1297_p9 }
 0x3ad   : > { %941 = dma.done.wait (!%p725_p10), %s552_s4, 128  }
 0x3ae   : > { %943 = vsyncadd (!%p725_p10), %s552_s4, 4294967168  ;;  %s22_s17 = sadd.s32 1, %s966_s17   ;;  %s1298_s25 = sld [smem:[#allocation17_spill]] }
 0x3af   : > { %p19_p12 = scmp.ge.s32.totalorder %s22_s17, 10   ;;  %s1299_s15 = sld [smem:[#allocation15_spill]] }
 0x3b0   : > { %s1300_s16 = sld [smem:[#allocation16_spill]]  ;;  %s1301_s12 = smov %s950_s13 }
 0x3b1   : > { %s1302_s13 = smov %s954_s14  ;;  %21 = sbr.rel (!%p19_p12) target bundleno = 10 (0xa), region = 119 }
 0x3b4   : > { %s1303_s14 = smov %s1298_s25 }
 0x3b8   :  { %557 = vsyncpa [#allocation6], 1 }
 0x3b9   :  { %559 = vsyncpa [#allocation6 + $0x1], 1 }
 0x3ba   :  { %560 = vsyncpa [#allocation9], 1 }
 0x3bb   :  { %562 = vsyncpa [#allocation9 + $0x1], 1 }
 0x3bc   :  { %563 = vsyncpa [#allocation7], 1 }
 0x3bd   :  { %565 = vsyncpa [#allocation7 + $0x1], 1 }

// kernel: gpt_block_forward.9
= control target key start
LH: loop header
LB: loop body
LE: loop exit
PB: predicated region body
PF: predicated region fallthrough
CT: control target
= control target key end

     0   :  { %9 = vsyncpa [#allocation3], 0  ;;  %s466_s0 = inlined_call_operand.hbm [shape: f32[16,32], index: 0, kind: input, shape index: {}]   ;;  %s467_s1 = inlined_call_operand.hbm [shape: f32[32,32], index: 1, kind: input, shape index: {}]   ;;  %s468_s2 = inlined_call_operand.hbm [shape: f32[1,32], index: 2, kind: input, shape index: {}]   ;;  %s469_s3 = inlined_call_operand.hbm [shape: f32[16,32], index: 3, kind: input, shape index: {}, may-alias: {3,4}]   ;;  %s470_s4 = inlined_call_operand.hbm [shape: f32[16,32], index: 4, kind: output, shape index: {}, may-alias: {3,4}]  }
   0x1   :  { %10 = vsyncpa [#allocation6], 0 }
   0x2   :  { %11 = vsyncpa [#allocation9], 0 }
   0x3   :  { %12 = vsyncpa [#allocation4], 0  ;;  %s344_s15 = smov [#allocation5]   ;;  %s345_s17 = smov [#allocation2]  }
   0x4   :  { %s30_s16 = sshll.u32 %s344_s15, 4  ;;  %s18_s18 = sshll.u32 %s345_s17, 4  ;;  %s31_s16 = int_to_ptr.vmem [resolvable:$true] %s30_s16  ;;  %s376_s18 = int_to_ptr.vmem [resolvable:$true] %s18_s18 }
   0x5   :  { %s226_s21 = scalar_lea.hbm %s467_s1, 512 }
   0x6   :  { %p227_p0 = scmp.ne.s32.totalorder %s467_s1, %s226_s21  ;;  %p230_p1 = scmp.lt.u32.totalorder %s226_s21, %s467_s1 }
   0x8   :  { %p232_p2 = pnand %p230_p1, %p227_p0 }
   0xa   :  { %235 = shalt.err (!%p232_p2)
}
   0xb   :  { %s236_s26 = scalar_lea.vmem %s31_s16, 512  ;;  %p241_p4 = scmp.lt.s32.totalorder %s31_s16, %s31_s16 }
   0xc   :  { %p237_p3 = scmp.ne.s32.totalorder %s31_s16, %s236_s26  ;;  %p242_p5 = scmp.lt.s32.totalorder %s236_s26, %s236_s26 }
   0xe   :  { %p243_p6 = por %p242_p5, %p241_p4 }
  0x10   :  { %p244_p7 = pnand %p243_p6, %p237_p3 }
  0x12   :  { %247 = shalt.err (!%p244_p7)
}
  0x13   :  { %s346_s27 = smov 128   ;;  %s347_s28 = smov 8  }
  0x14   :  { %36 = dma.hbm_to_vmem [thread:$0]  %s467_s1, 512, %s31_s16, [#allocation6], %s346_s27, %s346_s27, %s347_s28  }
  0x15   :  { %s248_s7 = scalar_lea.hbm %s466_s0, 256 }
  0x16   :  { %p249_p8 = scmp.ne.s32.totalorder %s466_s0, %s248_s7  ;;  %p252_p9 = scmp.lt.u32.totalorder %s248_s7, %s466_s0 }
  0x18   :  { %p254_p10 = pnand %p252_p9, %p249_p8 }
  0x1a   :  { %257 = shalt.err (!%p254_p10)
}
  0x1b   :  { %s258_s12 = scalar_lea.vmem %s376_s18, 256  ;;  %p263_p12 = scmp.lt.s32.totalorder %s376_s18, %s376_s18 }
  0x1c   :  { %p259_p11 = scmp.ne.s32.totalorder %s376_s18, %s258_s12  ;;  %p264_p13 = scmp.lt.s32.totalorder %s258_s12, %s258_s12 }
  0x1e   :  { %p265_p0 = por %p264_p13, %p263_p12 }
  0x20   :  { %p266_p1 = pnand %p265_p0, %p259_p11 }
  0x22   :  { %269 = shalt.err (!%p266_p1)
}
  0x23   :  { %24 = dma.hbm_to_vmem [thread:$0]  %s466_s0, 256, %s376_s18, [#allocation3], %s346_s27, %s346_s27, %s347_s28  }
  0x24   :  { %s348_s14 = smov [#allocation7]   ;;  %s349_s16 = smov [#allocation8]  }
  0x25   :  { %s43_s15 = sshll.u32 %s348_s14, 4  ;;  %s52_s17 = sshll.u32 %s349_s16, 4  ;;  %s44_s15 = int_to_ptr.vmem [resolvable:$true] %s43_s15  ;;  %s413_s17 = int_to_ptr.vmem [resolvable:$true] %s52_s17 }
  0x26   :  { %s270_s21 = scalar_lea.hbm %s468_s2, 16 }
  0x27   :  { %p271_p2 = scmp.ne.s32.totalorder %s468_s2, %s270_s21  ;;  %p274_p3 = scmp.lt.u32.totalorder %s270_s21, %s468_s2 }
  0x29   :  { %p276_p4 = pnand %p274_p3, %p271_p2 }
  0x2b   :  { %279 = shalt.err (!%p276_p4)
}
  0x2c   :  { %s280_s0 = scalar_lea.vmem %s44_s15, 16  ;;  %s284_s18 = scalar_lea.vmem %s44_s15, 32 }
  0x2d   :  { %p281_p5 = scmp.ne.s32.totalorder %s44_s15, %s280_s0  ;;  %p285_p6 = scmp.lt.s32.totalorder %s44_s15, %s44_s15 }
  0x2e   :  { %p286_p7 = scmp.lt.s32.totalorder %s284_s18, %s280_s0 }
  0x30   :  { %p287_p8 = por %p286_p7, %p285_p6 }
  0x32   :  { %p288_p9 = pnand %p287_p8, %p281_p5 }
  0x34   :  { %291 = shalt.err (!%p288_p9)
}
  0x35   :  { %46 = dma.hbm_to_vmem [thread:$0]  %s468_s2, 16, %s44_s15, [#allocation6]  }
  0x36   :  { %s292_s6 = scalar_lea.hbm %s469_s3, 256 }
  0x37   :  { %p293_p10 = scmp.ne.s32.totalorder %s469_s3, %s292_s6  ;;  %p296_p11 = scmp.lt.u32.totalorder %s292_s6, %s469_s3 }
  0x39   :  { %p298_p12 = pnand %p296_p11, %p293_p10 }
  0x3b   :  { %301 = shalt.err (!%p298_p12)
}
  0x3c   :  { %s302_s11 = scalar_lea.vmem %s413_s17, 256  ;;  %p307_p0 = scmp.lt.s32.totalorder %s413_s17, %s413_s17 }
  0x3d   :  { %p303_p13 = scmp.ne.s32.totalorder %s413_s17, %s302_s11  ;;  %p308_p1 = scmp.lt.s32.totalorder %s302_s11, %s302_s11 }
  0x3f   :  { %p309_p2 = por %p308_p1, %p307_p0 }
  0x41   :  { %p310_p3 = pnand %p309_p2, %p303_p13 }
  0x43   :  { %313 = shalt.err (!%p310_p3)
}
  0x44   :  { %58 = dma.hbm_to_vmem [thread:$0]  %s469_s3, 256, %s413_s17, [#allocation9], %s346_s27, %s346_s27, %s347_s28  }
  0x45   :  { %336 = dma.done.wait [#allocation3], 256  }
  0x46   :  { %337 = vsyncadd [#allocation3], 4294967040 }
  0x47   :  { %338 = dma.done.wait [#allocation6], 528  }
  0x48   :  { %339 = vsyncadd [#allocation6], 4294966768 }
  0x49   :  { %340 = dma.done.wait [#allocation9], 256  }
  0x4a   :  { %341 = vsyncadd [#allocation9], 4294967040  ;;  %vm84_vm0 = vcmask 261120   ;;  %v73_v0 = vld [vmem:[#allocation5] sm:$0xff]  ;;  %v74_v1 = vld [vmem:[#allocation5 + $0x8] sm:$0xff]  ;;  %s350_s3 = smov [#allocation10]  }
  0x4b   :  { %v75_v2 = vld [vmem:[#allocation5 + $0x10] sm:$0xff]  ;;  %v211_v3 = vpack.c.bf16 %v74_v1, %v73_v0  ;;  %v76_v4 = vld [vmem:[#allocation5 + $0x18] sm:$0xff]  ;;  %v191_v8 = vld [vmem:[#allocation7] ss:$0 sm:$0xff]  ;;  %s177_s1 = sshll.u32 %s350_s3, 4  ;;  %s178_s1 = int_to_ptr.vmem [resolvable:$true] %s177_s1 }
  0x4c   :  { %v71_v5 = vld [vmem:[#allocation2] sm:$0xff]  ;;  %v215_v6 = vpack.c.bf16 %v76_v4, %v75_v2  ;;  %v72_v7 = vld [vmem:[#allocation2 + $0x8] sm:$0xff]  ;;  %v166_v13 = vld [vmem:[#allocation8] sm:$0xff]  ;;  %s314_s13 = scalar_lea.vmem %s178_s1, 256  ;;  %p319_p5 = scmp.lt.s32.totalorder %s178_s1, %s178_s1 }
  0x4d   :  { %208 = vmatprep.mubr.msk.f32.mxu0 %vm84_vm0, %v71_v5  ;;  %212 = vmatprep.subr.bf16.mxu0 %v211_v3  ;;  %v167_v10 = vld [vmem:[#allocation8 + $0x8] sm:$0xff]  ;;  %p315_p4 = scmp.ne.s32.totalorder %s178_s1, %s314_s13  ;;  %p320_p6 = scmp.lt.s32.totalorder %s314_s13, %s314_s13 }
  0x4e   :  { %214 = vmatpush3.bf16.msra.mxu0 %v211_v3 }
  0x4f   :  { %216 = vmatprep.subr.bf16.mxu0 %v215_v6  ;;  %p321_p7 = por %p320_p6, %p319_p5 }
  0x51   :  { %p322_p8 = pnand %p321_p7, %p315_p4 }
  0x52   :  { %218 = vmatpush3.bf16.msra.mxu0 %v215_v6 }
  0x55   :  { %209 = vmatmul.mubr.msk.f32.vlgmr.msra.gmra.mrb[0].mxu0 %vm84_vm0, %v72_v7 }
 0x128   :  { %v210_v9 = vpop.f32.mrb[0].mxu0 }
 0x129   :  { %v163_v11 = vadd.f32 %v210_v9, %v191_v8  ;;  %v157_v12 = vpop.f32.mrb[1].mxu0 }
 0x12a   :  { %v158_v14 = vadd.f32 %v191_v8, %v157_v12 }
 0x12b   :  { %v169_v15 = vadd.f32 %v167_v10, %v163_v11 }
 0x12c   :  { %v168_v16 = vadd.f32 %v166_v13, %v158_v14 }
 0x12d   :  { %171 = vst.msk [vmem:[#allocation10 + $0x8] sm:$0xff] %vm84_vm0, %v169_v15 }
 0x12e   :  { %170 = vst.msk [vmem:[#allocation10] sm:$0xff] %vm84_vm0, %v168_v16 }
 0x12f   :  { %325 = shalt.err (!%p322_p8)
}
 0x130   :  { %s326_s16 = scalar_lea.hbm %s470_s4, 256 }
 0x131   :  { %p327_p9 = scmp.ne.s32.totalorder %s470_s4, %s326_s16  ;;  %p330_p10 = scmp.lt.u32.totalorder %s326_s16, %s470_s4 }
 0x133   :  { %p332_p11 = pnand %p330_p10, %p327_p9 }
 0x135   :  { %335 = shalt.err (!%p332_p11)
}
 0x136   :  { %183 = dma.vmem_to_hbm [thread:$0]  %s178_s1, 256, %s470_s4, [#allocation4], %s346_s27, %s346_s27, %s347_s28  }
 0x137   :  { %342 = dma.done.wait [#allocation4], 256  }
 0x138   :  { %343 = vsyncadd [#allocation4], 4294967040 }
 0x139   :  { %187 = vsyncpa [#allocation3], 1 }
 0x13a   :  { %188 = vsyncpa [#allocation6], 1 }
 0x13b   :  { %189 = vsyncpa [#allocation9], 1 }
 0x13c   :  { %190 = vsyncpa [#allocation4], 1 }

// kernel: gpt_block_forward.11
= control target key start
LH: loop header
LB: loop body
LE: loop exit
PB: predicated region body
PF: predicated region fallthrough
CT: control target
= control target key end

     0   :  { %13 = vsyncpa [#allocation3], 0  ;;  %s946_s0 = inlined_call_operand.hbm [shape: f32[16,32], index: 0, kind: input, shape index: {}]   ;;  %s947_s1 = inlined_call_operand.hbm [shape: f32[16,1], index: 1, kind: input, shape index: {}]   ;;  %s948_s2 = inlined_call_operand.hbm [shape: f32[16,1], index: 2, kind: input, shape index: {}]   ;;  %s949_s3 = inlined_call_operand.hbm [shape: f32[32,128], index: 3, kind: input, shape index: {}]   ;;  %s950_s4 = inlined_call_operand.hbm [shape: f32[1,128], index: 4, kind: input, shape index: {}]   ;;  %s951_s5 = inlined_call_operand.hbm [shape: f32[128,32], index: 5, kind: input, shape index: {}]   ;;  %s952_s6 = inlined_call_operand.hbm [shape: f32[1,32], index: 6, kind: input, shape index: {}]   ;;  %s953_s7 = inlined_call_operand.hbm [shape: f32[16,32], index: 7, kind: input, shape index: {}, may-alias: {7,8}]   ;;  %s954_s8 = inlined_call_operand.hbm [shape: f32[16,32], index: 8, kind: output, shape index: {}, may-alias: {7,8}]  }
   0x1   :  { %14 = vsyncpa [#allocation6], 0 }
   0x2   :  { %15 = vsyncpa [#allocation9], 0 }
   0x3   :  { %16 = vsyncpa [#allocation12], 0 }
   0x4   :  { %17 = vsyncpa [#allocation15], 0 }
   0x5   :  { %18 = vsyncpa [#allocation4], 0  ;;  %s735_s27 = smov [#allocation5]   ;;  %s736_s29 = smov [#allocation8]  }
   0x6   :  { %s36_s28 = sshll.u32 %s735_s27, 4  ;;  %s60_s30 = sshll.u32 %s736_s29, 4  ;;  %s37_s28 = int_to_ptr.vmem [resolvable:$true] %s36_s28  ;;  %s792_s30 = int_to_ptr.vmem [resolvable:$true] %s60_s30 }
   0x7   :  { %s525_s11 = scalar_lea.hbm %s947_s1, 256 }
   0x8   :  { %p526_p0 = scmp.ne.s32.totalorder %s947_s1, %s525_s11  ;;  %p529_p1 = scmp.lt.u32.totalorder %s525_s11, %s947_s1 }
   0xa   :  { %p531_p2 = pnand %p529_p1, %p526_p0 }
   0xc   :  { %534 = shalt.err (!%p531_p2)
}
   0xd   :  { %s535_s16 = scalar_lea.vmem %s37_s28, 256  ;;  %p540_p4 = scmp.lt.s32.totalorder %s37_s28, %s37_s28 }
   0xe   :  { %p536_p3 = scmp.ne.s32.totalorder %s37_s28, %s535_s16  ;;  %p541_p5 = scmp.lt.s32.totalorder %s535_s16, %s535_s16 }
  0x10   :  { %p542_p6 = por %p541_p5, %p540_p4 }
  0x12   :  { %p543_p7 = pnand %p542_p6, %p536_p3 }
  0x14   :  { %546 = shalt.err (!%p543_p7)
}
  0x15   :  { %s737_s17 = smov 128   ;;  %s738_s18 = smov 8  }
  0x16   :  { %42 = dma.hbm_to_vmem [thread:$0]  %s947_s1, 256, %s37_s28, [#allocation6], %s737_s17, %s737_s17, %s738_s18  }
  0x17   :  { %s547_s23 = scalar_lea.hbm %s949_s3, 512 }
  0x18   :  { %p548_p8 = scmp.ne.s32.totalorder %s949_s3, %s547_s23  ;;  %p551_p9 = scmp.lt.u32.totalorder %s547_s23, %s949_s3 }
  0x1a   :  { %p553_p10 = pnand %p551_p9, %p548_p8 }
  0x1c   :  { %556 = shalt.err (!%p553_p10)
}
  0x1d   :  { %s557_s29 = scalar_lea.vmem %s792_s30, 512  ;;  %p562_p12 = scmp.lt.s32.totalorder %s792_s30, %s792_s30 }
  0x1e   :  { %p558_p11 = scmp.ne.s32.totalorder %s792_s30, %s557_s29  ;;  %p563_p13 = scmp.lt.s32.totalorder %s557_s29, %s557_s29 }
  0x20   :  { %p564_p0 = por %p563_p13, %p562_p12 }
  0x22   :  { %p565_p1 = pnand %p564_p0, %p558_p11 }
  0x24   :  { %568 = shalt.err (!%p565_p1)
}
  0x25   :  { %66 = dma.hbm_to_vmem [thread:$0]  %s949_s3, 512, %s792_s30, [#allocation9], %s737_s17, %s737_s17, %s738_s18  }
  0x26   :  { %s739_s9 = smov [#allocation11]   ;;  %s740_s11 = smov [#allocation2]  }
  0x27   :  { %s82_s10 = sshll.u32 %s739_s9, 4  ;;  %s24_s12 = sshll.u32 %s740_s11, 4  ;;  %s83_s10 = int_to_ptr.vmem [resolvable:$true] %s82_s10  ;;  %s829_s12 = int_to_ptr.vmem [resolvable:$true] %s24_s12 }
  0x28   :  { %s569_s15 = scalar_lea.hbm %s951_s5, 2048 }
  0x29   :  { %p570_p2 = scmp.ne.s32.totalorder %s951_s5, %s569_s15  ;;  %p573_p3 = scmp.lt.u32.totalorder %s569_s15, %s951_s5 }
  0x2b   :  { %p575_p4 = pnand %p573_p3, %p570_p2 }
  0x2d   :  { %578 = shalt.err (!%p575_p4)
}
  0x2e   :  { %s579_s3 = scalar_lea.vmem %s83_s10, 2048  ;;  %p584_p6 = scmp.lt.s32.totalorder %s83_s10, %s83_s10 }
  0x2f   :  { %p580_p5 = scmp.ne.s32.totalorder %s83_s10, %s579_s3  ;;  %p585_p7 = scmp.lt.s32.totalorder %s579_s3, %s579_s3 }
  0x31   :  { %p586_p8 = por %p585_p7, %p584_p6 }
  0x33   :  { %p587_p9 = pnand %p586_p8, %p580_p5 }
  0x35   :  { %590 = shalt.err (!%p587_p9)
}
  0x36   :  { %88 = dma.hbm_to_vmem [thread:$0]  %s951_s5, 2048, %s83_s10, [#allocation12], %s737_s17, %s737_s17, %s738_s18  }
  0x37   :  { %s591_s25 = scalar_lea.hbm %s946_s0, 256 }
  0x38   :  { %p592_p10 = scmp.ne.s32.totalorder %s946_s0, %s591_s25  ;;  %p595_p11 = scmp.lt.u32.totalorder %s591_s25, %s946_s0 }
  0x3a   :  { %p597_p12 = pnand %p595_p11, %p592_p10 }
  0x3c   :  { %600 = shalt.err (!%p597_p12)
}
  0x3d   :  { %s601_s28 = scalar_lea.vmem %s829_s12, 256  ;;  %p606_p0 = scmp.lt.s32.totalorder %s829_s12, %s829_s12 }
  0x3e   :  { %p602_p13 = scmp.ne.s32.totalorder %s829_s12, %s601_s28  ;;  %p607_p1 = scmp.lt.s32.totalorder %s601_s28, %s601_s28 }
  0x40   :  { %p608_p2 = por %p607_p1, %p606_p0 }
  0x42   :  { %p609_p3 = pnand %p608_p2, %p602_p13 }
  0x44   :  { %612 = shalt.err (!%p609_p3)
}
  0x45   :  { %30 = dma.hbm_to_vmem [thread:$0]  %s946_s0, 256, %s829_s12, [#allocation3], %s737_s17, %s737_s17, %s738_s18  }
  0x46   :  { %s741_s10 = smov [#allocation7]   ;;  %s742_s13 = smov [#allocation10]  }
  0x47   :  { %s48_s11 = sshll.u32 %s741_s10, 4  ;;  %s73_s14 = sshll.u32 %s742_s13, 4  ;;  %s49_s11 = int_to_ptr.vmem [resolvable:$true] %s48_s11  ;;  %s74_s14 = int_to_ptr.vmem [resolvable:$true] %s73_s14 }
  0x48   :  { %s613_s19 = scalar_lea.hbm %s948_s2, 256 }
  0x49   :  { %p614_p4 = scmp.ne.s32.totalorder %s948_s2, %s613_s19  ;;  %p617_p5 = scmp.lt.u32.totalorder %s613_s19, %s948_s2 }
  0x4b   :  { %p619_p6 = pnand %p617_p5, %p614_p4 }
  0x4d   :  { %622 = shalt.err (!%p619_p6)
}
  0x4e   :  { %s623_s0 = scalar_lea.vmem %s49_s11, 256  ;;  %p628_p8 = scmp.lt.s32.totalorder %s49_s11, %s49_s11 }
  0x4f   :  { %p624_p7 = scmp.ne.s32.totalorder %s49_s11, %s623_s0  ;;  %p629_p9 = scmp.lt.s32.totalorder %s623_s0, %s623_s0 }
  0x51   :  { %p630_p10 = por %p629_p9, %p628_p8 }
  0x53   :  { %p631_p11 = pnand %p630_p10, %p624_p7 }
  0x55   :  { %634 = shalt.err (!%p631_p11)
}
  0x56   :  { %54 = dma.hbm_to_vmem [thread:$0]  %s948_s2, 256, %s49_s11, [#allocation6], %s737_s17, %s737_s17, %s738_s18  }
  0x57   :  { %s635_s25 = scalar_lea.hbm %s950_s4, 16 }
  0x58   :  { %p636_p12 = scmp.ne.s32.totalorder %s950_s4, %s635_s25  ;;  %p639_p13 = scmp.lt.u32.totalorder %s635_s25, %s950_s4 }
  0x5a   :  { %p641_p0 = pnand %p639_p13, %p636_p12 }
  0x5c   :  { %644 = shalt.err (!%p641_p0)
}
  0x5d   :  { %s645_s28 = scalar_lea.vmem %s74_s14, 16  ;;  %s649_s5 = scalar_lea.vmem %s74_s14, 32 }
  0x5e   :  { %p646_p1 = scmp.ne.s32.totalorder %s74_s14, %s645_s28  ;;  %p650_p2 = scmp.lt.s32.totalorder %s74_s14, %s74_s14 }
  0x5f   :  { %p651_p3 = scmp.lt.s32.totalorder %s649_s5, %s645_s28 }
  0x61   :  { %p652_p4 = por %p651_p3, %p650_p2 }
  0x63   :  { %p653_p5 = pnand %p652_p4, %p646_p1 }
  0x65   :  { %656 = shalt.err (!%p653_p5)
}
  0x66   :  { %76 = dma.hbm_to_vmem [thread:$0]  %s950_s4, 16, %s74_s14, [#allocation9]  }
  0x67   :  { %s743_s10 = smov [#allocation13]   ;;  %s744_s13 = smov [#allocation14]  }
  0x68   :  { %s95_s11 = sshll.u32 %s743_s10, 4  ;;  %s104_s15 = sshll.u32 %s744_s13, 4  ;;  %s96_s11 = int_to_ptr.vmem [resolvable:$true] %s95_s11  ;;  %s893_s15 = int_to_ptr.vmem [resolvable:$true] %s104_s15 }
  0x69   :  { %s657_s20 = scalar_lea.hbm %s952_s6, 16 }
  0x6a   :  { %p658_p6 = scmp.ne.s32.totalorder %s952_s6, %s657_s20  ;;  %p661_p7 = scmp.lt.u32.totalorder %s657_s20, %s952_s6 }
  0x6c   :  { %p663_p8 = pnand %p661_p7, %p658_p6 }
  0x6e   :  { %666 = shalt.err (!%p663_p8)
}
  0x6f   :  { %s667_s4 = scalar_lea.vmem %s96_s11, 16  ;;  %s671_s14 = scalar_lea.vmem %s96_s11, 32 }
  0x70   :  { %p668_p9 = scmp.ne.s32.totalorder %s96_s11, %s667_s4  ;;  %p672_p10 = scmp.lt.s32.totalorder %s96_s11, %s96_s11 }
  0x71   :  { %p673_p11 = scmp.lt.s32.totalorder %s671_s14, %s667_s4 }
  0x73   :  { %p674_p12 = por %p673_p11, %p672_p10 }
  0x75   :  { %p675_p13 = pnand %p674_p12, %p668_p9 }
  0x77   :  { %678 = shalt.err (!%p675_p13)
}
  0x78   :  { %98 = dma.hbm_to_vmem [thread:$0]  %s952_s6, 16, %s96_s11, [#allocation12]  }
  0x79   :  { %s679_s25 = scalar_lea.hbm %s953_s7, 256 }
  0x7a   :  { %p680_p0 = scmp.ne.s32.totalorder %s953_s7, %s679_s25  ;;  %p683_p1 = scmp.lt.u32.totalorder %s679_s25, %s953_s7 }
  0x7c   :  { %p685_p2 = pnand %p683_p1, %p680_p0 }
  0x7e   :  { %688 = shalt.err (!%p685_p2)
}
  0x7f   :  { %s689_s28 = scalar_lea.vmem %s893_s15, 256  ;;  %p694_p4 = scmp.lt.s32.totalorder %s893_s15, %s893_s15 }
  0x80   :  { %p690_p3 = scmp.ne.s32.totalorder %s893_s15, %s689_s28  ;;  %p695_p5 = scmp.lt.s32.totalorder %s689_s28, %s689_s28 }
  0x82   :  { %p696_p6 = por %p695_p5, %p694_p4 }
  0x84   :  { %p697_p7 = pnand %p696_p6, %p690_p3 }
  0x86   :  { %700 = shalt.err (!%p697_p7)
}
  0x87   :  { %110 = dma.hbm_to_vmem [thread:$0]  %s953_s7, 256, %s893_s15, [#allocation15], %s737_s17, %s737_s17, %s738_s18  }
  0x88   :  { %723 = dma.done.wait [#allocation3], 256  }
  0x89   :  { %724 = vsyncadd [#allocation3], 4294967040 }
  0x8a   :  { %725 = dma.done.wait [#allocation6], 512  }
  0x8b   :  { %726 = vsyncadd [#allocation6], 4294966784 }
  0x8c   :  { %727 = dma.done.wait [#allocation9], 528  }
  0x8d   :  { %728 = vsyncadd [#allocation9], 4294966768 }
  0x8e   :  { %729 = dma.done.wait [#allocation12], 2064  }
  0x8f   :  { %730 = vsyncadd [#allocation12], 4294965232 }
  0x90   :  { %731 = dma.done.wait [#allocation15], 256  }
  0x91   :  { %732 = vsyncadd [#allocation15], 4294967040  ;;  %v745_v0 = vmov 0   ;;  %v151_v1 = vld [vmem:[#allocation7] sm:$0xff]  ;;  %v137_v2 = vld [vmem:[#allocation5] sm:$0xff]  ;;  %vm176_vm0 = vcmask 261120  }
  0x92   :  { %520 = vset.pattern.permute.xlu1 %v745_v0  ;;  %519 = vset.pattern.permute.xlu0 %v745_v0  ;;  %v152_v3 = vld [vmem:[#allocation7 + $0x8] sm:$0xff]  ;;  %v138_v4 = vld [vmem:[#allocation5 + $0x8] sm:$0xff]  ;;  %v165_v5 = vld [vmem:[#allocation8] sm:$0xff]  ;;  %s746_s7 = smov [#allocation16]  }
  0x93   :  { %155 = vperm.xlu1 %520, %v151_v1   ;;  %141 = vperm.xlu0 %519, %v137_v2   ;;  %v166_v6 = vld [vmem:[#allocation8 + $0x8] sm:$0xff]  ;;  %v167_v7 = vld [vmem:[#allocation8 + $0x10] sm:$0xff]  ;;  %v168_v8 = vld [vmem:[#allocation8 + $0x18] sm:$0xff]  ;;  %s377_s2 = sshll.u32 %s746_s7, 4  ;;  %s378_s2 = int_to_ptr.vmem [resolvable:$true] %s377_s2 }
  0x94   :  { %v467_v9 = vpack.c.bf16 %v166_v6, %v165_v5  ;;  %v471_v10 = vpack.c.bf16 %v168_v8, %v167_v7  ;;  %v268_v11 = vld [vmem:[#allocation11] sm:$0xff]  ;;  %v269_v12 = vld [vmem:[#allocation11 + $0x8] sm:$0xff]  ;;  %v270_v13 = vld [vmem:[#allocation11 + $0x10] sm:$0xff]  ;;  %s701_s9 = scalar_lea.vmem %s378_s2, 256  ;;  %p706_p9 = scmp.lt.s32.totalorder %s378_s2, %s378_s2 }
  0x95   :  { %v475_v14 = vpack.c.bf16 %v269_v12, %v268_v11  ;;  %v271_v15 = vld [vmem:[#allocation11 + $0x18] sm:$0xff]  ;;  %v272_v17 = vld [vmem:[#allocation11 + $0x20] sm:$0xff]  ;;  %v273_v18 = vld [vmem:[#allocation11 + $0x28] sm:$0xff]  ;;  %p702_p8 = scmp.ne.s32.totalorder %s378_s2, %s701_s9  ;;  %p707_p10 = scmp.lt.s32.totalorder %s701_s9, %s701_s9 }
  0x96   :  { %468 = vmatprep.subr.bf16.mxu0 %v467_v9  ;;  %v479_v16 = vpack.c.bf16 %v271_v15, %v270_v13  ;;  %v483_v19 = vpack.c.bf16 %v273_v18, %v272_v17  ;;  %v135_v20 = vld [vmem:[#allocation2] sm:$0xff]  ;;  %v136_v24 = vld [vmem:[#allocation2 + $0x8] sm:$0xff]  ;;  %v276_v33 = vld [vmem:[#allocation11 + $0x40] sm:$0xff] }
  0x97   :  { %160 = vperm.xlu1 %520, %v152_v3   ;;  %146 = vperm.xlu0 %519, %v138_v4   ;;  %v274_v30 = vld [vmem:[#allocation11 + $0x30] sm:$0xff]  ;;  %v275_v31 = vld [vmem:[#allocation11 + $0x38] sm:$0xff]  ;;  %v277_v34 = vld [vmem:[#allocation11 + $0x48] sm:$0xff]  ;;  %p708_p11 = por %p707_p10, %p706_p9 }
  0x98   :  { %470 = vmatpush3.bf16.msra.mxu0 %v467_v9  ;;  %476 = vmatprep.subr.bf16.mxu1 %v475_v14  ;;  %v487_v32 = vpack.c.bf16 %v275_v31, %v274_v30  ;;  %v491_v35 = vpack.c.bf16 %v277_v34, %v276_v33  ;;  %v278_v36 = vld [vmem:[#allocation11 + $0x50] sm:$0xff]  ;;  %v279_v37 = vld [vmem:[#allocation11 + $0x58] sm:$0xff]  ;;  %v280_v39 = vld [vmem:[#allocation11 + $0x60] sm:$0xff] }
  0x99   :  { %472 = vmatprep.subr.bf16.mxu0 %v471_v10  ;;  %478 = vmatpush3.bf16.msra.mxu1 %v475_v14  ;;  %v495_v38 = vpack.c.bf16 %v279_v37, %v278_v36  ;;  %v281_v40 = vld [vmem:[#allocation11 + $0x68] sm:$0xff]  ;;  %v282_v42 = vld [vmem:[#allocation11 + $0x70] sm:$0xff]  ;;  %v283_v43 = vld [vmem:[#allocation11 + $0x78] sm:$0xff]  ;;  %p709_p12 = pnand %p708_p11, %p702_p8 }
  0x9a   :  { %480 = vmatprep.subr.bf16.mxu1 %v479_v16  ;;  %v499_v41 = vpack.c.bf16 %v281_v40, %v280_v39  ;;  %v503_v44 = vpack.c.bf16 %v283_v43, %v282_v42  ;;  %v393_v45 = vld [vmem:[#allocation10] ss:$0 sm:$0xff]  ;;  %v396_v60 = vld [vmem:[#allocation13] ss:$0 sm:$0xff]  ;;  %v367_v62 = vld [vmem:[#allocation14 + $0x8] sm:$0xff] }
  0x9b   :  { %v366_v1 = vld [vmem:[#allocation14] sm:$0xff] }
  0x9c   :  { %474 = vmatpush3.bf16.msra.mxu0 %v471_v10 }
  0x9d   :  { %482 = vmatpush3.bf16.msra.mxu1 %v479_v16 }
  0x9e   :  { %484 = vmatprep.subr.bf16.mxu1 %v483_v19 }
  0xa1   :  { %486 = vmatpush3.bf16.msra.mxu1 %v483_v19 }
  0xa2   :  { %488 = vmatprep.subr.bf16.mxu1 %v487_v32 }
  0xa5   :  { %490 = vmatpush3.bf16.msra.mxu1 %v487_v32 }
  0xa6   :  { %492 = vmatprep.subr.bf16.mxu1 %v491_v35 }
  0xa9   :  { %494 = vmatpush3.bf16.msra.mxu1 %v491_v35 }
  0xaa   :  { %496 = vmatprep.subr.bf16.mxu1 %v495_v38 }
  0xad   :  { %498 = vmatpush3.bf16.msra.mxu1 %v495_v38 }
  0xae   :  { %500 = vmatprep.subr.bf16.mxu1 %v499_v41 }
  0xb1   :  { %502 = vmatpush3.bf16.msra.mxu1 %v499_v41 }
  0xb2   :  { %504 = vmatprep.subr.bf16.mxu1 %v503_v44 }
  0xb5   :  { %506 = vmatpush3.bf16.msra.mxu1 %v503_v44 }
 0x112   :  { %v156_v21 = vpop.permute.xlu1 %155  ;;  %v142_v22 = vpop.permute.xlu0 %141 }
 0x113   :  { %v149_v23 = vsub.f32 %v135_v20, %v142_v22 }
 0x115   :  { %v163_v25 = vmul.f32 %v156_v21, %v149_v23 }
 0x116   :  { %v147_v26 = vpop.permute.xlu0 %146  ;;  %v161_v28 = vpop.permute.xlu1 %160 }
 0x117   :  { %v150_v27 = vsub.f32 %v136_v24, %v147_v26  ;;  %429 = vmatprep.mubr.msk.f32.mxu0 %vm176_vm0, %v163_v25 }
 0x119   :  { %v164_v29 = vmul.f32 %v161_v28, %v150_v27 }
 0x11b   :  { %430 = vmatmul.mubr.msk.f32.vlgmr.msra.gmra.mrb[0].mxu0 %vm176_vm0, %v164_v29 }
 0x1ee   :  { %v431_v46 = vpop.f32.mrb[0].mxu0 }
 0x1ef   :  { %v255_v47 = vadd.f32 %v431_v46, %v393_v45  ;;  %v249_v48 = vpop.f32.mrb[1].mxu0 }
 0x1f0   :  { %v250_v49 = vadd.f32 %v393_v45, %v249_v48 }
 0x1f1   :  { %v261_v50 = vmul.f32 0.70710677, %v255_v47  ;;  %v259_v57 = vmul.f32 0.5, %v255_v47 }
 0x1f2   :  { %v260_v51 = vmul.f32 0.70710677, %v250_v49  ;;  %v258_v55 = vmul.f32 0.5, %v250_v49 }
 0x1f3   :  { %521 = verf.f32 %v261_v50 }
 0x1f4   :  { %523 = verf.f32 %v260_v51 }
 0x1fd   :  { %v522_v52 = vpop.eup %521 }
 0x1fe   :  { %v524_v53 = vpop.eup %523  ;;  %v265_v54 = vadd.f32 1.0, %v522_v52 }
 0x1ff   :  { %v264_v56 = vadd.f32 1.0, %v524_v53 }
 0x200   :  { %v267_v59 = vmul.f32 %v265_v54, %v259_v57 }
 0x201   :  { %v266_v58 = vmul.f32 %v264_v56, %v258_v55 }
 0x203   :  { %464 = vmatprep.mubr.f32.mxu1 %v266_v58 }
 0x204   :  { %465 = vmatmul.mubr.f32.vlgmr.msra.gmra.mrb[0].mxu1 %v267_v59 }
 0x2d7   :  { %v466_v61 = vpop.f32.mrb[0].mxu1 }
 0x2d8   :  { %v363_v63 = vadd.f32 %v466_v61, %v396_v60  ;;  %v357_v0 = vpop.f32.mrb[1].mxu1 }
 0x2d9   :  { %v358_v2 = vadd.f32 %v396_v60, %v357_v0 }
 0x2da   :  { %v369_v3 = vadd.f32 %v367_v62, %v363_v63 }
 0x2db   :  { %v368_v4 = vadd.f32 %v366_v1, %v358_v2 }
 0x2dc   :  { %371 = vst.msk [vmem:[#allocation16 + $0x8] sm:$0xff] %vm176_vm0, %v369_v3 }
 0x2dd   :  { %370 = vst.msk [vmem:[#allocation16] sm:$0xff] %vm176_vm0, %v368_v4 }
 0x2de   :  { %712 = shalt.err (!%p709_p12)
}
 0x2df   :  { %s713_s13 = scalar_lea.hbm %s954_s8, 256 }
 0x2e0   :  { %p714_p13 = scmp.ne.s32.totalorder %s954_s8, %s713_s13  ;;  %p717_p0 = scmp.lt.u32.totalorder %s713_s13, %s954_s8 }
 0x2e2   :  { %p719_p1 = pnand %p717_p0, %p714_p13 }
 0x2e4   :  { %722 = shalt.err (!%p719_p1)
}
 0x2e5   :  { %383 = dma.vmem_to_hbm [thread:$0]  %s378_s2, 256, %s954_s8, [#allocation4], %s737_s17, %s737_s17, %s738_s18  }
 0x2e6   :  { %733 = dma.done.wait [#allocation4], 256  }
 0x2e7   :  { %734 = vsyncadd [#allocation4], 4294967040 }
 0x2e8   :  { %387 = vsyncpa [#allocation3], 1 }
 0x2e9   :  { %388 = vsyncpa [#allocation6], 1 }
 0x2ea   :  { %389 = vsyncpa [#allocation9], 1 }
 0x2eb   :  { %390 = vsyncpa [#allocation12], 1 }
 0x2ec   :  { %391 = vsyncpa [#allocation15], 1 }
 0x2ed   :  { %392 = vsyncpa [#allocation4], 1 }

</bundles_post_ra>
